<compile_context>
chip_gen: v5e
topology: v5e:2x2
jax: 0.10.0
libtpu: 0.0.40
codegen_flags: <defaults>
</compile_context>

<pallas_src>
import functools

import jax
import jax.numpy as jnp
from jax.experimental import pallas as pl
from jax.experimental.pallas import tpu as pltpu

LANE = 128                       # every feature / hidden dim padded to this
MAX_TD = 512                     # dst-row tile for SAGE layers
MAX_TE = 1024                    # edge tile for the decoder
_VMEM_LIMIT = 32 * 1024 * 1024   # safe on v5e/v6e (128 MiB) and v7x (64 MiB)


def _round_up(x, m):
    return ((x + m - 1) // m) * m


def _pick_tile(n, max_tile):
    base = _round_up(max(n, 1), LANE)
    return max_tile if base >= max_tile else base


def _pad2(x, rows, cols, dtype):
    out = jnp.zeros((rows, cols), dtype)
    return out.at[: x.shape[0], : x.shape[1]].set(x.astype(dtype))


# ----------------------------------------------------------------------------
# Pallas kernels
# ----------------------------------------------------------------------------
def _sage_kernel(adj_ref, xsrc_ref, xdst_ref, wl_ref, bl_ref, wr_ref,
                 out_ref, *, relu):
    """One SAGEConv (mean aggr) for one dst tile; x_src fully resident."""
    # (TD, n_src) x (n_src, F_src): bf16 on the MXU, f32 accumulate.
    agg = jnp.dot(adj_ref[...], xsrc_ref[...],
                  preferred_element_type=jnp.float32)
    h = jnp.dot(agg.astype(jnp.bfloat16), wl_ref[...],
                preferred_element_type=jnp.float32)
    h = h + jnp.dot(xdst_ref[...], wr_ref[...],
                    preferred_element_type=jnp.float32)
    h = h + bl_ref[...]                               # (1, F_out) f32 broadcast
    if relu:
        h = jnp.maximum(h, 0.0)
    out_ref[...] = h.astype(out_ref.dtype)


def _decoder_kernel(zu_ref, zm_ref, w1u_ref, w1m_ref, b1_ref, w2_ref, b2_ref,
                    out_ref):
    """lin2(relu(lin1(cat(zu, zm))))  via split W1 (no concat).

    lin2 is computed as w2 (8, H) @ h.T (H, TE) -> (8, TE); only row 0 of w2
    is real, so row 0 of the output is the logit row (lane-dense writeback).
    """
    h = jnp.dot(zu_ref[...], w1u_ref[...], preferred_element_type=jnp.float32)
    h = h + jnp.dot(zm_ref[...], w1m_ref[...],
                    preferred_element_type=jnp.float32)
    h = jnp.maximum(h + b1_ref[...], 0.0)             # (TE, H) f32
    logits = jnp.dot(w2_ref[...], h.astype(jnp.bfloat16).T,
                     preferred_element_type=jnp.float32)   # (8, TE)
    out_ref[...] = logits + b2_ref[0, 0]


# ----------------------------------------------------------------------------
# Pallas wrappers
# ----------------------------------------------------------------------------
def sage_layer(adj, x_src, x_dst, w_l, b_l, w_r, *, relu):
    """One hetero-instantiated SAGEConv for a single edge type (padded dims)."""
    n_dst, n_src = adj.shape
    f_src = x_src.shape[1]
    f_dst = x_dst.shape[1]
    f_out = w_l.shape[1]
    td = MAX_TD if n_dst % MAX_TD == 0 else n_dst
    grid = (n_dst // td,)
    kern = functools.partial(_sage_kernel, relu=relu)
    return pl.pallas_call(
        kern,
        out_shape=jax.ShapeDtypeStruct((n_dst, f_out), jnp.bfloat16),
        grid_spec=pltpu.PrefetchScalarGridSpec(
            num_scalar_prefetch=0,
            grid=grid,
            in_specs=[
                pl.BlockSpec((td, n_src), lambda i: (i, 0)),        # adj strip
                pl.BlockSpec((n_src, f_src), lambda i: (0, 0)),     # x_src (resident)
                pl.BlockSpec((td, f_dst), lambda i: (i, 0)),        # x_dst
                pl.BlockSpec((f_src, f_out), lambda i: (0, 0)),     # w_l
                pl.BlockSpec((1, f_out), lambda i: (0, 0)),         # b_l
                pl.BlockSpec((f_dst, f_out), lambda i: (0, 0)),     # w_r
            ],
            out_specs=pl.BlockSpec((td, f_out), lambda i: (i, 0)),
        ),
        compiler_params=pltpu.CompilerParams(
            dimension_semantics=("parallel",),
            vmem_limit_bytes=_VMEM_LIMIT,
        ),
    )(adj, x_src, x_dst, w_l, b_l, w_r)


def edge_decoder(zu, zm, w1u, w1m, b1, w2, b2, n_valid):
    e_pad, h = zu.shape
    te = MAX_TE if e_pad % MAX_TE == 0 else e_pad
    grid = (e_pad // te,)
    out = pl.pallas_call(
        _decoder_kernel,
        out_shape=jax.ShapeDtypeStruct((8, e_pad), jnp.float32),
        grid_spec=pltpu.PrefetchScalarGridSpec(
            num_scalar_prefetch=0,
            grid=grid,
            in_specs=[
                pl.BlockSpec((te, h), lambda i: (i, 0)),        # z_user[row]
                pl.BlockSpec((te, h), lambda i: (i, 0)),        # z_movie[col]
                pl.BlockSpec((h, h), lambda i: (0, 0)),         # W1_user
                pl.BlockSpec((h, h), lambda i: (0, 0)),         # W1_movie
                pl.BlockSpec((1, h), lambda i: (0, 0)),         # b1
                pl.BlockSpec((8, h), lambda i: (0, 0)),         # W2 (row 0 real)
                pl.BlockSpec(memory_space=pltpu.MemorySpace.SMEM),  # b2 (1,1)
            ],
            out_specs=pl.BlockSpec((8, te), lambda i: (0, i)),
        ),
        compiler_params=pltpu.CompilerParams(
            dimension_semantics=("parallel",),
            vmem_limit_bytes=_VMEM_LIMIT,
        ),
    )(zu, zm, w1u, w1m, b1, w2, b2)
    return out[0, :n_valid]                 # .view(-1); row 0 holds the logits


# ----------------------------------------------------------------------------
# Glue (graph setup / parameter init / padding) — plain JAX
# ----------------------------------------------------------------------------
def mean_adj(edge_index, n_dst_pad, n_src_pad):
    """Row-normalized dense adjacency: A[i, j] = 1/deg(i) if j -> i (bf16)."""
    src = edge_index[0]
    dst = edge_index[1]
    a = jnp.zeros((n_dst_pad, n_src_pad), jnp.float32).at[dst, src].add(1.0)
    deg = a.sum(axis=1, keepdims=True)
    return (a / jnp.maximum(deg, 1.0)).astype(jnp.bfloat16)


def prepare_graph(edge_index_dict, n_user, n_movie):
    """Built ONCE per graph (outside the jitted forward) and reused by both convs."""
    n_u_pad = _round_up(n_user, _pick_tile(n_user, MAX_TD))
    n_m_pad = _round_up(n_movie, _pick_tile(n_movie, MAX_TD))
    adj_um = mean_adj(edge_index_dict[("user", "rates", "movie")],
                      n_m_pad, n_u_pad)       # rows = movies (dst), cols = users
    adj_mu = mean_adj(edge_index_dict[("movie", "rev_rates", "user")],
                      n_u_pad, n_m_pad)       # rows = users  (dst), cols = movies
    return adj_um, adj_mu


def init_linear(key, f_in, f_out, bias=True):
    kw, kb = jax.random.split(key)
    scale = 1.0 / jnp.sqrt(jnp.float32(f_in))
    w = jax.random.uniform(kw, (f_in, f_out), jnp.float32, -scale, scale)
    if bias:
        b = jax.random.uniform(kb, (1, f_out), jnp.float32, -scale, scale)
        return w, b
    return w


def init_params(key, f_user, f_movie, hidden):
    ks = jax.random.split(key, 12)
    p = {}
    # conv1, edge type (user -rates-> movie): lin_l on user feats, lin_r movie
    p["c1_um_wl"], p["c1_um_bl"] = init_linear(ks[0], f_user, hidden)
    p["c1_um_wr"] = init_linear(ks[1], f_movie, hidden, bias=False)
    # conv1, edge type (movie -rev_rates-> user)
    p["c1_mu_wl"], p["c1_mu_bl"] = init_linear(ks[2], f_movie, hidden)
    p["c1_mu_wr"] = init_linear(ks[3], f_user, hidden, bias=False)
    # conv2, (user -> movie)
    p["c2_um_wl"], p["c2_um_bl"] = init_linear(ks[4], hidden, hidden)
    p["c2_um_wr"] = init_linear(ks[5], hidden, hidden, bias=False)
    # conv2, (movie -> user)
    p["c2_mu_wl"], p["c2_mu_bl"] = init_linear(ks[6], hidden, hidden)
    p["c2_mu_wr"] = init_linear(ks[7], hidden, hidden, bias=False)
    # decoder
    p["dec_w1"], p["dec_b1"] = init_linear(ks[8], 2 * hidden, hidden)
    p["dec_w2"], p["dec_b2"] = init_linear(ks[9], hidden, 1)
    return p


def prepare_params(p, hidden):
    """Zero-pad all parameters to lane-dense shapes; matmul operands -> bf16."""
    def w(x):
        return _pad2(x, LANE, LANE, jnp.bfloat16)

    def b(x):
        return _pad2(x, 1, LANE, jnp.float32)

    q = {}
    for name in ("c1_um", "c1_mu", "c2_um", "c2_mu"):
        q[name + "_wl"] = w(p[name + "_wl"])
        q[name + "_bl"] = b(p[name + "_bl"])
        q[name + "_wr"] = w(p[name + "_wr"])
    # split decoder W1: cat(zu, zm) @ W1 == zu @ W1u + zm @ W1m
    q["dec_w1u"] = w(p["dec_w1"][:hidden])
    q["dec_w1m"] = w(p["dec_w1"][hidden:])
    q["dec_b1"] = b(p["dec_b1"])
    # lin2 weight transposed into an (8, 128) row block; only row 0 is real.
    q["dec_w2"] = _pad2(p["dec_w2"].T, 8, LANE, jnp.bfloat16)
    q["dec_b2"] = p["dec_b2"].astype(jnp.float32)       # (1, 1) scalar -> SMEM
    return q


def model_forward(pparams, x_user, x_movie, adj_um, adj_mu, edge_label_index):
    n_m_pad, n_u_pad = adj_um.shape
    xu = _pad2(x_user, n_u_pad, LANE, jnp.bfloat16)
    xm = _pad2(x_movie, n_m_pad, LANE, jnp.bfloat16)

    # --- encoder: conv1 + relu ---
    h_movie = sage_layer(adj_um, xu, xm,
                         pparams["c1_um_wl"], pparams["c1_um_bl"],
                         pparams["c1_um_wr"], relu=True)
    h_user = sage_layer(adj_mu, xm, xu,
                        pparams["c1_mu_wl"], pparams["c1_mu_bl"],
                        pparams["c1_mu_wr"], relu=True)

    # --- encoder: conv2 (no relu) ---
    z_movie = sage_layer(adj_um, h_user, h_movie,
                         pparams["c2_um_wl"], pparams["c2_um_bl"],
                         pparams["c2_um_wr"], relu=False)
    z_user = sage_layer(adj_mu, h_movie, h_user,
                        pparams["c2_mu_wl"], pparams["c2_mu_bl"],
                        pparams["c2_mu_wr"], relu=False)

    # --- decoder ---
    row = edge_label_index[0]
    col = edge_label_index[1]
    e = row.shape[0]
    te = _pick_tile(e, MAX_TE)
    e_pad = _round_up(e, te)
    row_p = jnp.zeros((e_pad,), jnp.int32).at[:e].set(row)
    col_p = jnp.zeros((e_pad,), jnp.int32).at[:e].set(col)
    # TODO(synk): fold this gather into edge_decoder via scalar-prefetched indices.
    zu = z_user[row_p]                     # (e_pad, 128) bf16 gather
    zm = z_movie[col_p]
    return edge_decoder(zu, zm,
                        pparams["dec_w1u"], pparams["dec_w1m"],
                        pparams["dec_b1"], pparams["dec_w2"],
                        pparams["dec_b2"], e)


# ----------------------------------------------------------------------------
# Example run
# ----------------------------------------------------------------------------
if __name__ == "__main__":
    hidden = 32
    n_user, n_movie = 12, 20
    f_user, f_movie = 16, 24
    n_edges, n_label = 80, 16

    key = jax.random.PRNGKey(0)
    kx_u, kx_m, ke_s, ke_d, kl_s, kl_d, kp = jax.random.split(key, 7)

    x_dict = {
        "user": jax.random.normal(kx_u, (n_user, f_user), jnp.float32),
        "movie": jax.random.normal(kx_m, (n_movie, f_movie), jnp.float32),
    }

    e_user = jax.random.randint(ke_s, (n_edges,), 0, n_user, jnp.int32)
    e_movie = jax.random.randint(ke_d, (n_edges,), 0, n_movie, jnp.int32)
    edge_index_dict = {
        ("user", "rates", "movie"): jnp.stack([e_user, e_movie]),
        ("movie", "rev_rates", "user"): jnp.stack([e_movie, e_user]),
    }

    edge_label_index = jnp.stack([
        jax.random.randint(kl_s, (n_label,), 0, n_user, jnp.int32),
        jax.random.randint(kl_d, (n_label,), 0, n_movie, jnp.int32),
    ])

    params = init_params(kp, f_user, f_movie, hidden)
    pparams = prepare_params(params, hidden)

    # Graph-static adjacencies built once, outside the jitted forward.
    adj_um, adj_mu = prepare_graph(edge_index_dict, n_user, n_movie)

    fwd = jax.jit(model_forward)
    out = fwd(pparams, x_dict["user"], x_dict["movie"], adj_um, adj_mu,
              edge_label_index)
    out = jax.block_until_ready(out)
    assert out.shape == (n_label,) and out.dtype == jnp.float32
    print("KERNEL_OK")
</pallas_src>

<mosaic_0001>
module attributes {stable_mosaic.version = 11 : i64} {
  func.func @_sage_kernel(%arg0: i32, %arg1: memref<128x128xbf16, #tpu.memory_space<vmem>>, %arg2: memref<128x128xbf16, #tpu.memory_space<vmem>>, %arg3: memref<128x128xbf16, #tpu.memory_space<vmem>>, %arg4: memref<128x128xbf16, #tpu.memory_space<vmem>>, %arg5: memref<1x128xf32, #tpu.memory_space<vmem>>, %arg6: memref<128x128xbf16, #tpu.memory_space<vmem>>, %arg7: memref<128x128xbf16, #tpu.memory_space<vmem>>) attributes {dimension_semantics = [#tpu.dimension_semantics<parallel>], iteration_bounds = array<i64: 1>, scalar_prefetch = 0 : i64, scratch_operands = 0 : i64, tpu.core_type = #tpu.core_type<tc>, window_params = [{transform_indices = @transform_0, window_bounds = array<i64: 128, 128>}, {pipeline_mode = #tpu.pipeline_mode<synchronous>, transform_indices = @transform_1, window_bounds = array<i64: 128, 128>}, {transform_indices = @transform_2, window_bounds = array<i64: 128, 128>}, {pipeline_mode = #tpu.pipeline_mode<synchronous>, transform_indices = @transform_3, window_bounds = array<i64: 128, 128>}, {pipeline_mode = #tpu.pipeline_mode<synchronous>, transform_indices = @transform_4, window_bounds = array<i64: 1, 128>}, {pipeline_mode = #tpu.pipeline_mode<synchronous>, transform_indices = @transform_5, window_bounds = array<i64: 128, 128>}, {transform_indices = @transform_6, window_bounds = array<i64: 128, 128>}]} {
    %c0 = arith.constant 0 : index
    %c0_0 = arith.constant 0 : index
    %0 = vector.load %arg1[%c0, %c0_0] : memref<128x128xbf16, #tpu.memory_space<vmem>>, vector<128x128xbf16>
    %c0_1 = arith.constant 0 : index
    %c0_2 = arith.constant 0 : index
    %1 = vector.load %arg2[%c0_1, %c0_2] : memref<128x128xbf16, #tpu.memory_space<vmem>>, vector<128x128xbf16>
    %cst = arith.constant dense<0.000000e+00> : vector<128x128xf32>
    %2 = tpu.matmul %0, %1, %cst {dimension_numbers = #tpu.dot_dimension_numbers<[1], [0], [0], [1], [0, 0, 1, 1], [], []>} : vector<128x128xbf16>, vector<128x128xbf16>, vector<128x128xf32> -> vector<128x128xf32>
    %3 = arith.truncf %2 : vector<128x128xf32> to vector<128x128xbf16>
    %c0_3 = arith.constant 0 : index
    %c0_4 = arith.constant 0 : index
    %4 = vector.load %arg4[%c0_3, %c0_4] : memref<128x128xbf16, #tpu.memory_space<vmem>>, vector<128x128xbf16>
    %cst_5 = arith.constant dense<0.000000e+00> : vector<128x128xf32>
    %5 = tpu.matmul %3, %4, %cst_5 {dimension_numbers = #tpu.dot_dimension_numbers<[1], [0], [0], [1], [0, 0, 1, 1], [], []>} : vector<128x128xbf16>, vector<128x128xbf16>, vector<128x128xf32> -> vector<128x128xf32>
    %c0_6 = arith.constant 0 : index
    %c0_7 = arith.constant 0 : index
    %6 = vector.load %arg3[%c0_6, %c0_7] : memref<128x128xbf16, #tpu.memory_space<vmem>>, vector<128x128xbf16>
    %c0_8 = arith.constant 0 : index
    %c0_9 = arith.constant 0 : index
    %7 = vector.load %arg6[%c0_8, %c0_9] : memref<128x128xbf16, #tpu.memory_space<vmem>>, vector<128x128xbf16>
    %cst_10 = arith.constant dense<0.000000e+00> : vector<128x128xf32>
    %8 = tpu.matmul %6, %7, %cst_10 {dimension_numbers = #tpu.dot_dimension_numbers<[1], [0], [0], [1], [0, 0, 1, 1], [], []>} : vector<128x128xbf16>, vector<128x128xbf16>, vector<128x128xf32> -> vector<128x128xf32>
    %9 = arith.addf %5, %8 : vector<128x128xf32>
    %c0_11 = arith.constant 0 : index
    %c0_12 = arith.constant 0 : index
    %10 = vector.load %arg5[%c0_11, %c0_12] : memref<1x128xf32, #tpu.memory_space<vmem>>, vector<1x128xf32>
    %11 = vector.broadcast %10 : vector<1x128xf32> to vector<128x128xf32>
    %12 = arith.addf %9, %11 : vector<128x128xf32>
    %cst_13 = arith.constant 0.000000e+00 : f32
    %13 = vector.broadcast %cst_13 : f32 to vector<128x128xf32>
    %14 = arith.maximumf %12, %13 : vector<128x128xf32>
    %15 = arith.truncf %14 : vector<128x128xf32> to vector<128x128xbf16>
    %c0_14 = arith.constant 0 : index
    %c0_15 = arith.constant 0 : index
    %16 = vector.load %arg7[%c0_14, %c0_15] : memref<128x128xbf16, #tpu.memory_space<vmem>>, vector<128x128xbf16>
    tpu.vector_store %arg7[%c0_14, %c0_15], %15 {strides = array<i32>} : memref<128x128xbf16, #tpu.memory_space<vmem>>, vector<128x128xbf16>,
    return
  }
  func.func @transform_0(%arg0: i32) -> (i32, i32) {
    %c0_i32 = arith.constant 0 : i32
    %c0_i32_0 = arith.constant 0 : i32
    return %arg0, %c0_i32 : i32, i32
  }
  func.func @transform_1(%arg0: i32) -> (i32, i32) {
    %c0_i32 = arith.constant 0 : i32
    %c0_i32_0 = arith.constant 0 : i32
    %c0_i32_1 = arith.constant 0 : i32
    return %c0_i32, %c0_i32_0 : i32, i32
  }
  func.func @transform_2(%arg0: i32) -> (i32, i32) {
    %c0_i32 = arith.constant 0 : i32
    %c0_i32_0 = arith.constant 0 : i32
    return %arg0, %c0_i32 : i32, i32
  }
  func.func @transform_3(%arg0: i32) -> (i32, i32) {
    %c0_i32 = arith.constant 0 : i32
    %c0_i32_0 = arith.constant 0 : i32
    %c0_i32_1 = arith.constant 0 : i32
    return %c0_i32, %c0_i32_0 : i32, i32
  }
  func.func @transform_4(%arg0: i32) -> (i32, i32) {
    %c0_i32 = arith.constant 0 : i32
    %c0_i32_0 = arith.constant 0 : i32
    %c0_i32_1 = arith.constant 0 : i32
    return %c0_i32, %c0_i32_0 : i32, i32
  }
  func.func @transform_5(%arg0: i32) -> (i32, i32) {
    %c0_i32 = arith.constant 0 : i32
    %c0_i32_0 = arith.constant 0 : i32
    %c0_i32_1 = arith.constant 0 : i32
    return %c0_i32, %c0_i32_0 : i32, i32
  }
  func.func @transform_6(%arg0: i32) -> (i32, i32) {
    %c0_i32 = arith.constant 0 : i32
    %c0_i32_0 = arith.constant 0 : i32
    return %arg0, %c0_i32 : i32, i32
  }
}

module attributes {stable_mosaic.version = 11 : i64} {
  func.func @_sage_kernel(%arg0: i32, %arg1: memref<128x128xbf16, #tpu.memory_space<vmem>>, %arg2: memref<128x128xbf16, #tpu.memory_space<vmem>>, %arg3: memref<128x128xbf16, #tpu.memory_space<vmem>>, %arg4: memref<128x128xbf16, #tpu.memory_space<vmem>>, %arg5: memref<1x128xf32, #tpu.memory_space<vmem>>, %arg6: memref<128x128xbf16, #tpu.memory_space<vmem>>, %arg7: memref<128x128xbf16, #tpu.memory_space<vmem>>) attributes {dimension_semantics = [#tpu.dimension_semantics<parallel>], iteration_bounds = array<i64: 1>, scalar_prefetch = 0 : i64, scratch_operands = 0 : i64, tpu.core_type = #tpu.core_type<tc>, window_params = [{transform_indices = @transform_0, window_bounds = array<i64: 128, 128>}, {pipeline_mode = #tpu.pipeline_mode<synchronous>, transform_indices = @transform_1, window_bounds = array<i64: 128, 128>}, {transform_indices = @transform_2, window_bounds = array<i64: 128, 128>}, {pipeline_mode = #tpu.pipeline_mode<synchronous>, transform_indices = @transform_3, window_bounds = array<i64: 128, 128>}, {pipeline_mode = #tpu.pipeline_mode<synchronous>, transform_indices = @transform_4, window_bounds = array<i64: 1, 128>}, {pipeline_mode = #tpu.pipeline_mode<synchronous>, transform_indices = @transform_5, window_bounds = array<i64: 128, 128>}, {transform_indices = @transform_6, window_bounds = array<i64: 128, 128>}]} {
    %c0 = arith.constant 0 : index
    %c0_0 = arith.constant 0 : index
    %0 = vector.load %arg1[%c0, %c0_0] : memref<128x128xbf16, #tpu.memory_space<vmem>>, vector<128x128xbf16>
    %c0_1 = arith.constant 0 : index
    %c0_2 = arith.constant 0 : index
    %1 = vector.load %arg2[%c0_1, %c0_2] : memref<128x128xbf16, #tpu.memory_space<vmem>>, vector<128x128xbf16>
    %cst = arith.constant dense<0.000000e+00> : vector<128x128xf32>
    %2 = tpu.matmul %0, %1, %cst {dimension_numbers = #tpu.dot_dimension_numbers<[1], [0], [0], [1], [0, 0, 1, 1], [], []>} : vector<128x128xbf16>, vector<128x128xbf16>, vector<128x128xf32> -> vector<128x128xf32>
    %3 = arith.truncf %2 : vector<128x128xf32> to vector<128x128xbf16>
    %c0_3 = arith.constant 0 : index
    %c0_4 = arith.constant 0 : index
    %4 = vector.load %arg4[%c0_3, %c0_4] : memref<128x128xbf16, #tpu.memory_space<vmem>>, vector<128x128xbf16>
    %cst_5 = arith.constant dense<0.000000e+00> : vector<128x128xf32>
    %5 = tpu.matmul %3, %4, %cst_5 {dimension_numbers = #tpu.dot_dimension_numbers<[1], [0], [0], [1], [0, 0, 1, 1], [], []>} : vector<128x128xbf16>, vector<128x128xbf16>, vector<128x128xf32> -> vector<128x128xf32>
    %c0_6 = arith.constant 0 : index
    %c0_7 = arith.constant 0 : index
    %6 = vector.load %arg3[%c0_6, %c0_7] : memref<128x128xbf16, #tpu.memory_space<vmem>>, vector<128x128xbf16>
    %c0_8 = arith.constant 0 : index
    %c0_9 = arith.constant 0 : index
    %7 = vector.load %arg6[%c0_8, %c0_9] : memref<128x128xbf16, #tpu.memory_space<vmem>>, vector<128x128xbf16>
    %cst_10 = arith.constant dense<0.000000e+00> : vector<128x128xf32>
    %8 = tpu.matmul %6, %7, %cst_10 {dimension_numbers = #tpu.dot_dimension_numbers<[1], [0], [0], [1], [0, 0, 1, 1], [], []>} : vector<128x128xbf16>, vector<128x128xbf16>, vector<128x128xf32> -> vector<128x128xf32>
    %9 = arith.addf %5, %8 : vector<128x128xf32>
    %c0_11 = arith.constant 0 : index
    %c0_12 = arith.constant 0 : index
    %10 = vector.load %arg5[%c0_11, %c0_12] : memref<1x128xf32, #tpu.memory_space<vmem>>, vector<1x128xf32>
    %11 = vector.broadcast %10 : vector<1x128xf32> to vector<128x128xf32>
    %12 = arith.addf %9, %11 : vector<128x128xf32>
    %cst_13 = arith.constant 0.000000e+00 : f32
    %13 = vector.broadcast %cst_13 : f32 to vector<128x128xf32>
    %14 = arith.maximumf %12, %13 : vector<128x128xf32>
    %15 = arith.truncf %14 : vector<128x128xf32> to vector<128x128xbf16>
    %c0_14 = arith.constant 0 : index
    %c0_15 = arith.constant 0 : index
    %16 = vector.load %arg7[%c0_14, %c0_15] : memref<128x128xbf16, #tpu.memory_space<vmem>>, vector<128x128xbf16>
    tpu.vector_store %arg7[%c0_14, %c0_15], %15 {strides = array<i32>} : memref<128x128xbf16, #tpu.memory_space<vmem>>, vector<128x128xbf16>,
    return
  }
  func.func @transform_0(%arg0: i32) -> (i32, i32) {
    %c0_i32 = arith.constant 0 : i32
    %c0_i32_0 = arith.constant 0 : i32
    return %arg0, %c0_i32 : i32, i32
  }
  func.func @transform_1(%arg0: i32) -> (i32, i32) {
    %c0_i32 = arith.constant 0 : i32
    %c0_i32_0 = arith.constant 0 : i32
    %c0_i32_1 = arith.constant 0 : i32
    return %c0_i32, %c0_i32_0 : i32, i32
  }
  func.func @transform_2(%arg0: i32) -> (i32, i32) {
    %c0_i32 = arith.constant 0 : i32
    %c0_i32_0 = arith.constant 0 : i32
    return %arg0, %c0_i32 : i32, i32
  }
  func.func @transform_3(%arg0: i32) -> (i32, i32) {
    %c0_i32 = arith.constant 0 : i32
    %c0_i32_0 = arith.constant 0 : i32
    %c0_i32_1 = arith.constant 0 : i32
    return %c0_i32, %c0_i32_0 : i32, i32
  }
  func.func @transform_4(%arg0: i32) -> (i32, i32) {
    %c0_i32 = arith.constant 0 : i32
    %c0_i32_0 = arith.constant 0 : i32
    %c0_i32_1 = arith.constant 0 : i32
    return %c0_i32, %c0_i32_0 : i32, i32
  }
  func.func @transform_5(%arg0: i32) -> (i32, i32) {
    %c0_i32 = arith.constant 0 : i32
    %c0_i32_0 = arith.constant 0 : i32
    %c0_i32_1 = arith.constant 0 : i32
    return %c0_i32, %c0_i32_0 : i32, i32
  }
  func.func @transform_6(%arg0: i32) -> (i32, i32) {
    %c0_i32 = arith.constant 0 : i32
    %c0_i32_0 = arith.constant 0 : i32
    return %arg0, %c0_i32 : i32, i32
  }
}

module attributes {stable_mosaic.version = 11 : i64} {
  func.func @_sage_kernel(%arg0: i32, %arg1: memref<128x128xbf16, #tpu.memory_space<vmem>>, %arg2: memref<128x128xbf16, #tpu.memory_space<vmem>>, %arg3: memref<128x128xbf16, #tpu.memory_space<vmem>>, %arg4: memref<128x128xbf16, #tpu.memory_space<vmem>>, %arg5: memref<1x128xf32, #tpu.memory_space<vmem>>, %arg6: memref<128x128xbf16, #tpu.memory_space<vmem>>, %arg7: memref<128x128xbf16, #tpu.memory_space<vmem>>) attributes {dimension_semantics = [#tpu.dimension_semantics<parallel>], iteration_bounds = array<i64: 1>, scalar_prefetch = 0 : i64, scratch_operands = 0 : i64, tpu.core_type = #tpu.core_type<tc>, window_params = [{transform_indices = @transform_0, window_bounds = array<i64: 128, 128>}, {pipeline_mode = #tpu.pipeline_mode<synchronous>, transform_indices = @transform_1, window_bounds = array<i64: 128, 128>}, {transform_indices = @transform_2, window_bounds = array<i64: 128, 128>}, {pipeline_mode = #tpu.pipeline_mode<synchronous>, transform_indices = @transform_3, window_bounds = array<i64: 128, 128>}, {pipeline_mode = #tpu.pipeline_mode<synchronous>, transform_indices = @transform_4, window_bounds = array<i64: 1, 128>}, {pipeline_mode = #tpu.pipeline_mode<synchronous>, transform_indices = @transform_5, window_bounds = array<i64: 128, 128>}, {transform_indices = @transform_6, window_bounds = array<i64: 128, 128>}]} {
    %c0 = arith.constant 0 : index
    %c0_0 = arith.constant 0 : index
    %0 = vector.load %arg1[%c0, %c0_0] : memref<128x128xbf16, #tpu.memory_space<vmem>>, vector<128x128xbf16>
    %c0_1 = arith.constant 0 : index
    %c0_2 = arith.constant 0 : index
    %1 = vector.load %arg2[%c0_1, %c0_2] : memref<128x128xbf16, #tpu.memory_space<vmem>>, vector<128x128xbf16>
    %cst = arith.constant dense<0.000000e+00> : vector<128x128xf32>
    %2 = tpu.matmul %0, %1, %cst {dimension_numbers = #tpu.dot_dimension_numbers<[1], [0], [0], [1], [0, 0, 1, 1], [], []>} : vector<128x128xbf16>, vector<128x128xbf16>, vector<128x128xf32> -> vector<128x128xf32>
    %3 = arith.truncf %2 : vector<128x128xf32> to vector<128x128xbf16>
    %c0_3 = arith.constant 0 : index
    %c0_4 = arith.constant 0 : index
    %4 = vector.load %arg4[%c0_3, %c0_4] : memref<128x128xbf16, #tpu.memory_space<vmem>>, vector<128x128xbf16>
    %cst_5 = arith.constant dense<0.000000e+00> : vector<128x128xf32>
    %5 = tpu.matmul %3, %4, %cst_5 {dimension_numbers = #tpu.dot_dimension_numbers<[1], [0], [0], [1], [0, 0, 1, 1], [], []>} : vector<128x128xbf16>, vector<128x128xbf16>, vector<128x128xf32> -> vector<128x128xf32>
    %c0_6 = arith.constant 0 : index
    %c0_7 = arith.constant 0 : index
    %6 = vector.load %arg3[%c0_6, %c0_7] : memref<128x128xbf16, #tpu.memory_space<vmem>>, vector<128x128xbf16>
    %c0_8 = arith.constant 0 : index
    %c0_9 = arith.constant 0 : index
    %7 = vector.load %arg6[%c0_8, %c0_9] : memref<128x128xbf16, #tpu.memory_space<vmem>>, vector<128x128xbf16>
    %cst_10 = arith.constant dense<0.000000e+00> : vector<128x128xf32>
    %8 = tpu.matmul %6, %7, %cst_10 {dimension_numbers = #tpu.dot_dimension_numbers<[1], [0], [0], [1], [0, 0, 1, 1], [], []>} : vector<128x128xbf16>, vector<128x128xbf16>, vector<128x128xf32> -> vector<128x128xf32>
    %9 = arith.addf %5, %8 : vector<128x128xf32>
    %c0_11 = arith.constant 0 : index
    %c0_12 = arith.constant 0 : index
    %10 = vector.load %arg5[%c0_11, %c0_12] : memref<1x128xf32, #tpu.memory_space<vmem>>, vector<1x128xf32>
    %11 = vector.broadcast %10 : vector<1x128xf32> to vector<128x128xf32>
    %12 = arith.addf %9, %11 : vector<128x128xf32>
    %13 = arith.truncf %12 : vector<128x128xf32> to vector<128x128xbf16>
    %c0_13 = arith.constant 0 : index
    %c0_14 = arith.constant 0 : index
    %14 = vector.load %arg7[%c0_13, %c0_14] : memref<128x128xbf16, #tpu.memory_space<vmem>>, vector<128x128xbf16>
    tpu.vector_store %arg7[%c0_13, %c0_14], %13 {strides = array<i32>} : memref<128x128xbf16, #tpu.memory_space<vmem>>, vector<128x128xbf16>,
    return
  }
  func.func @transform_0(%arg0: i32) -> (i32, i32) {
    %c0_i32 = arith.constant 0 : i32
    %c0_i32_0 = arith.constant 0 : i32
    return %arg0, %c0_i32 : i32, i32
  }
  func.func @transform_1(%arg0: i32) -> (i32, i32) {
    %c0_i32 = arith.constant 0 : i32
    %c0_i32_0 = arith.constant 0 : i32
    %c0_i32_1 = arith.constant 0 : i32
    return %c0_i32, %c0_i32_0 : i32, i32
  }
  func.func @transform_2(%arg0: i32) -> (i32, i32) {
    %c0_i32 = arith.constant 0 : i32
    %c0_i32_0 = arith.constant 0 : i32
    return %arg0, %c0_i32 : i32, i32
  }
  func.func @transform_3(%arg0: i32) -> (i32, i32) {
    %c0_i32 = arith.constant 0 : i32
    %c0_i32_0 = arith.constant 0 : i32
    %c0_i32_1 = arith.constant 0 : i32
    return %c0_i32, %c0_i32_0 : i32, i32
  }
  func.func @transform_4(%arg0: i32) -> (i32, i32) {
    %c0_i32 = arith.constant 0 : i32
    %c0_i32_0 = arith.constant 0 : i32
    %c0_i32_1 = arith.constant 0 : i32
    return %c0_i32, %c0_i32_0 : i32, i32
  }
  func.func @transform_5(%arg0: i32) -> (i32, i32) {
    %c0_i32 = arith.constant 0 : i32
    %c0_i32_0 = arith.constant 0 : i32
    %c0_i32_1 = arith.constant 0 : i32
    return %c0_i32, %c0_i32_0 : i32, i32
  }
  func.func @transform_6(%arg0: i32) -> (i32, i32) {
    %c0_i32 = arith.constant 0 : i32
    %c0_i32_0 = arith.constant 0 : i32
    return %arg0, %c0_i32 : i32, i32
  }
}

module attributes {stable_mosaic.version = 11 : i64} {
  func.func @_sage_kernel(%arg0: i32, %arg1: memref<128x128xbf16, #tpu.memory_space<vmem>>, %arg2: memref<128x128xbf16, #tpu.memory_space<vmem>>, %arg3: memref<128x128xbf16, #tpu.memory_space<vmem>>, %arg4: memref<128x128xbf16, #tpu.memory_space<vmem>>, %arg5: memref<1x128xf32, #tpu.memory_space<vmem>>, %arg6: memref<128x128xbf16, #tpu.memory_space<vmem>>, %arg7: memref<128x128xbf16, #tpu.memory_space<vmem>>) attributes {dimension_semantics = [#tpu.dimension_semantics<parallel>], iteration_bounds = array<i64: 1>, scalar_prefetch = 0 : i64, scratch_operands = 0 : i64, tpu.core_type = #tpu.core_type<tc>, window_params = [{transform_indices = @transform_0, window_bounds = array<i64: 128, 128>}, {pipeline_mode = #tpu.pipeline_mode<synchronous>, transform_indices = @transform_1, window_bounds = array<i64: 128, 128>}, {transform_indices = @transform_2, window_bounds = array<i64: 128, 128>}, {pipeline_mode = #tpu.pipeline_mode<synchronous>, transform_indices = @transform_3, window_bounds = array<i64: 128, 128>}, {pipeline_mode = #tpu.pipeline_mode<synchronous>, transform_indices = @transform_4, window_bounds = array<i64: 1, 128>}, {pipeline_mode = #tpu.pipeline_mode<synchronous>, transform_indices = @transform_5, window_bounds = array<i64: 128, 128>}, {transform_indices = @transform_6, window_bounds = array<i64: 128, 128>}]} {
    %c0 = arith.constant 0 : index
    %c0_0 = arith.constant 0 : index
    %0 = vector.load %arg1[%c0, %c0_0] : memref<128x128xbf16, #tpu.memory_space<vmem>>, vector<128x128xbf16>
    %c0_1 = arith.constant 0 : index
    %c0_2 = arith.constant 0 : index
    %1 = vector.load %arg2[%c0_1, %c0_2] : memref<128x128xbf16, #tpu.memory_space<vmem>>, vector<128x128xbf16>
    %cst = arith.constant dense<0.000000e+00> : vector<128x128xf32>
    %2 = tpu.matmul %0, %1, %cst {dimension_numbers = #tpu.dot_dimension_numbers<[1], [0], [0], [1], [0, 0, 1, 1], [], []>} : vector<128x128xbf16>, vector<128x128xbf16>, vector<128x128xf32> -> vector<128x128xf32>
    %3 = arith.truncf %2 : vector<128x128xf32> to vector<128x128xbf16>
    %c0_3 = arith.constant 0 : index
    %c0_4 = arith.constant 0 : index
    %4 = vector.load %arg4[%c0_3, %c0_4] : memref<128x128xbf16, #tpu.memory_space<vmem>>, vector<128x128xbf16>
    %cst_5 = arith.constant dense<0.000000e+00> : vector<128x128xf32>
    %5 = tpu.matmul %3, %4, %cst_5 {dimension_numbers = #tpu.dot_dimension_numbers<[1], [0], [0], [1], [0, 0, 1, 1], [], []>} : vector<128x128xbf16>, vector<128x128xbf16>, vector<128x128xf32> -> vector<128x128xf32>
    %c0_6 = arith.constant 0 : index
    %c0_7 = arith.constant 0 : index
    %6 = vector.load %arg3[%c0_6, %c0_7] : memref<128x128xbf16, #tpu.memory_space<vmem>>, vector<128x128xbf16>
    %c0_8 = arith.constant 0 : index
    %c0_9 = arith.constant 0 : index
    %7 = vector.load %arg6[%c0_8, %c0_9] : memref<128x128xbf16, #tpu.memory_space<vmem>>, vector<128x128xbf16>
    %cst_10 = arith.constant dense<0.000000e+00> : vector<128x128xf32>
    %8 = tpu.matmul %6, %7, %cst_10 {dimension_numbers = #tpu.dot_dimension_numbers<[1], [0], [0], [1], [0, 0, 1, 1], [], []>} : vector<128x128xbf16>, vector<128x128xbf16>, vector<128x128xf32> -> vector<128x128xf32>
    %9 = arith.addf %5, %8 : vector<128x128xf32>
    %c0_11 = arith.constant 0 : index
    %c0_12 = arith.constant 0 : index
    %10 = vector.load %arg5[%c0_11, %c0_12] : memref<1x128xf32, #tpu.memory_space<vmem>>, vector<1x128xf32>
    %11 = vector.broadcast %10 : vector<1x128xf32> to vector<128x128xf32>
    %12 = arith.addf %9, %11 : vector<128x128xf32>
    %13 = arith.truncf %12 : vector<128x128xf32> to vector<128x128xbf16>
    %c0_13 = arith.constant 0 : index
    %c0_14 = arith.constant 0 : index
    %14 = vector.load %arg7[%c0_13, %c0_14] : memref<128x128xbf16, #tpu.memory_space<vmem>>, vector<128x128xbf16>
    tpu.vector_store %arg7[%c0_13, %c0_14], %13 {strides = array<i32>} : memref<128x128xbf16, #tpu.memory_space<vmem>>, vector<128x128xbf16>,
    return
  }
  func.func @transform_0(%arg0: i32) -> (i32, i32) {
    %c0_i32 = arith.constant 0 : i32
    %c0_i32_0 = arith.constant 0 : i32
    return %arg0, %c0_i32 : i32, i32
  }
  func.func @transform_1(%arg0: i32) -> (i32, i32) {
    %c0_i32 = arith.constant 0 : i32
    %c0_i32_0 = arith.constant 0 : i32
    %c0_i32_1 = arith.constant 0 : i32
    return %c0_i32, %c0_i32_0 : i32, i32
  }
  func.func @transform_2(%arg0: i32) -> (i32, i32) {
    %c0_i32 = arith.constant 0 : i32
    %c0_i32_0 = arith.constant 0 : i32
    return %arg0, %c0_i32 : i32, i32
  }
  func.func @transform_3(%arg0: i32) -> (i32, i32) {
    %c0_i32 = arith.constant 0 : i32
    %c0_i32_0 = arith.constant 0 : i32
    %c0_i32_1 = arith.constant 0 : i32
    return %c0_i32, %c0_i32_0 : i32, i32
  }
  func.func @transform_4(%arg0: i32) -> (i32, i32) {
    %c0_i32 = arith.constant 0 : i32
    %c0_i32_0 = arith.constant 0 : i32
    %c0_i32_1 = arith.constant 0 : i32
    return %c0_i32, %c0_i32_0 : i32, i32
  }
  func.func @transform_5(%arg0: i32) -> (i32, i32) {
    %c0_i32 = arith.constant 0 : i32
    %c0_i32_0 = arith.constant 0 : i32
    %c0_i32_1 = arith.constant 0 : i32
    return %c0_i32, %c0_i32_0 : i32, i32
  }
  func.func @transform_6(%arg0: i32) -> (i32, i32) {
    %c0_i32 = arith.constant 0 : i32
    %c0_i32_0 = arith.constant 0 : i32
    return %arg0, %c0_i32 : i32, i32
  }
}

module attributes {stable_mosaic.version = 11 : i64} {
  func.func @_decoder_kernel(%arg0: i32, %arg1: memref<128x128xbf16, #tpu.memory_space<vmem>>, %arg2: memref<128x128xbf16, #tpu.memory_space<vmem>>, %arg3: memref<128x128xbf16, #tpu.memory_space<vmem>>, %arg4: memref<128x128xbf16, #tpu.memory_space<vmem>>, %arg5: memref<1x128xf32, #tpu.memory_space<vmem>>, %arg6: memref<8x128xbf16, #tpu.memory_space<vmem>>, %arg7: memref<1x1xf32, #tpu.memory_space<smem>>, %arg8: memref<8x128xf32, #tpu.memory_space<vmem>>) attributes {dimension_semantics = [#tpu.dimension_semantics<parallel>], iteration_bounds = array<i64: 1>, scalar_prefetch = 0 : i64, scratch_operands = 0 : i64, tpu.core_type = #tpu.core_type<tc>, window_params = [{transform_indices = @transform_0, window_bounds = array<i64: 128, 128>}, {transform_indices = @transform_1, window_bounds = array<i64: 128, 128>}, {pipeline_mode = #tpu.pipeline_mode<synchronous>, transform_indices = @transform_2, window_bounds = array<i64: 128, 128>}, {pipeline_mode = #tpu.pipeline_mode<synchronous>, transform_indices = @transform_3, window_bounds = array<i64: 128, 128>}, {pipeline_mode = #tpu.pipeline_mode<synchronous>, transform_indices = @transform_4, window_bounds = array<i64: 1, 128>}, {pipeline_mode = #tpu.pipeline_mode<synchronous>, transform_indices = @transform_5, window_bounds = array<i64: 8, 128>}, {transform_indices = @transform_6, window_bounds = array<i64: 1, 1>}, {transform_indices = @transform_7, window_bounds = array<i64: 8, 128>}]} {
    %c0 = arith.constant 0 : index
    %c0_0 = arith.constant 0 : index
    %0 = vector.load %arg1[%c0, %c0_0] : memref<128x128xbf16, #tpu.memory_space<vmem>>, vector<128x128xbf16>
    %c0_1 = arith.constant 0 : index
    %c0_2 = arith.constant 0 : index
    %1 = vector.load %arg3[%c0_1, %c0_2] : memref<128x128xbf16, #tpu.memory_space<vmem>>, vector<128x128xbf16>
    %cst = arith.constant dense<0.000000e+00> : vector<128x128xf32>
    %2 = tpu.matmul %0, %1, %cst {dimension_numbers = #tpu.dot_dimension_numbers<[1], [0], [0], [1], [0, 0, 1, 1], [], []>} : vector<128x128xbf16>, vector<128x128xbf16>, vector<128x128xf32> -> vector<128x128xf32>
    %c0_3 = arith.constant 0 : index
    %c0_4 = arith.constant 0 : index
    %3 = vector.load %arg2[%c0_3, %c0_4] : memref<128x128xbf16, #tpu.memory_space<vmem>>, vector<128x128xbf16>
    %c0_5 = arith.constant 0 : index
    %c0_6 = arith.constant 0 : index
    %4 = vector.load %arg4[%c0_5, %c0_6] : memref<128x128xbf16, #tpu.memory_space<vmem>>, vector<128x128xbf16>
    %cst_7 = arith.constant dense<0.000000e+00> : vector<128x128xf32>
    %5 = tpu.matmul %3, %4, %cst_7 {dimension_numbers = #tpu.dot_dimension_numbers<[1], [0], [0], [1], [0, 0, 1, 1], [], []>} : vector<128x128xbf16>, vector<128x128xbf16>, vector<128x128xf32> -> vector<128x128xf32>
    %6 = arith.addf %2, %5 : vector<128x128xf32>
    %c0_8 = arith.constant 0 : index
    %c0_9 = arith.constant 0 : index
    %7 = vector.load %arg5[%c0_8, %c0_9] : memref<1x128xf32, #tpu.memory_space<vmem>>, vector<1x128xf32>
    %8 = vector.broadcast %7 : vector<1x128xf32> to vector<128x128xf32>
    %9 = arith.addf %6, %8 : vector<128x128xf32>
    %cst_10 = arith.constant 0.000000e+00 : f32
    %10 = vector.broadcast %cst_10 : f32 to vector<128x128xf32>
    %11 = arith.maximumf %9, %10 : vector<128x128xf32>
    %c0_11 = arith.constant 0 : index
    %c0_12 = arith.constant 0 : index
    %12 = vector.load %arg6[%c0_11, %c0_12] : memref<8x128xbf16, #tpu.memory_space<vmem>>, vector<8x128xbf16>
    %13 = arith.truncf %11 : vector<128x128xf32> to vector<128x128xbf16>
    %14 = tpu.transpose %13, [1, 0] : vector<128x128xbf16> -> vector<128x128xbf16>
    %cst_13 = arith.constant dense<0.000000e+00> : vector<8x128xf32>
    %15 = tpu.matmul %12, %14, %cst_13 {dimension_numbers = #tpu.dot_dimension_numbers<[1], [0], [0], [1], [0, 0, 1, 1], [], []>} : vector<8x128xbf16>, vector<128x128xbf16>, vector<8x128xf32> -> vector<8x128xf32>
    %c0_14 = arith.constant 0 : index
    %c0_15 = arith.constant 0 : index
    %16 = memref.load %arg7[%c0_14, %c0_15] : memref<1x1xf32, #tpu.memory_space<smem>>
    %17 = vector.broadcast %16 : f32 to vector<8x128xf32>
    %18 = arith.addf %15, %17 : vector<8x128xf32>
    %c0_16 = arith.constant 0 : index
    %c0_17 = arith.constant 0 : index
    %19 = vector.load %arg8[%c0_16, %c0_17] : memref<8x128xf32, #tpu.memory_space<vmem>>, vector<8x128xf32>
    tpu.vector_store %arg8[%c0_16, %c0_17], %18 {strides = array<i32>} : memref<8x128xf32, #tpu.memory_space<vmem>>, vector<8x128xf32>,
    return
  }
  func.func @transform_0(%arg0: i32) -> (i32, i32) {
    %c0_i32 = arith.constant 0 : i32
    %c0_i32_0 = arith.constant 0 : i32
    return %arg0, %c0_i32 : i32, i32
  }
  func.func @transform_1(%arg0: i32) -> (i32, i32) {
    %c0_i32 = arith.constant 0 : i32
    %c0_i32_0 = arith.constant 0 : i32
    return %arg0, %c0_i32 : i32, i32
  }
  func.func @transform_2(%arg0: i32) -> (i32, i32) {
    %c0_i32 = arith.constant 0 : i32
    %c0_i32_0 = arith.constant 0 : i32
    %c0_i32_1 = arith.constant 0 : i32
    return %c0_i32, %c0_i32_0 : i32, i32
  }
  func.func @transform_3(%arg0: i32) -> (i32, i32) {
    %c0_i32 = arith.constant 0 : i32
    %c0_i32_0 = arith.constant 0 : i32
    %c0_i32_1 = arith.constant 0 : i32
    return %c0_i32, %c0_i32_0 : i32, i32
  }
  func.func @transform_4(%arg0: i32) -> (i32, i32) {
    %c0_i32 = arith.constant 0 : i32
    %c0_i32_0 = arith.constant 0 : i32
    %c0_i32_1 = arith.constant 0 : i32
    return %c0_i32, %c0_i32_0 : i32, i32
  }
  func.func @transform_5(%arg0: i32) -> (i32, i32) {
    %c0_i32 = arith.constant 0 : i32
    %c0_i32_0 = arith.constant 0 : i32
    %c0_i32_1 = arith.constant 0 : i32
    return %c0_i32, %c0_i32_0 : i32, i32
  }
  func.func @transform_6(%arg0: i32) -> (i32, i32) {
    %c0_i32 = arith.constant 0 : i32
    %c0_i32_0 = arith.constant 0 : i32
    %c0_i32_1 = arith.constant 0 : i32
    return %c0_i32, %c0_i32_0 : i32, i32
  }
  func.func @transform_7(%arg0: i32) -> (i32, i32) {
    %c0_i32 = arith.constant 0 : i32
    %c0_i32_0 = arith.constant 0 : i32
    return %c0_i32, %arg0 : i32, i32
  }
}

</mosaic_0001>

<bundles_post_ra>
// kernel: model_forward.7
= control target key start
LH: loop header
LB: loop body
LE: loop exit
PB: predicated region body
PF: predicated region fallthrough
CT: control target
= control target key end

     0   :  { %11 = vsyncpa [#allocation3], 0  ;;  %s1098_s0 = inlined_call_operand.hbm [shape: bf16[128,128], index: 0, kind: input, shape index: {}]   ;;  %s1099_s1 = inlined_call_operand.vmem [shape: bf16[128,128], index: 1, kind: input, shape index: {}]   ;;  %s1100_s2 = inlined_call_operand.vmem [shape: bf16[128,128], index: 2, kind: input, shape index: {}]   ;;  %s1101_s3 = inlined_call_operand.hbm [shape: bf16[128,128], index: 3, kind: input, shape index: {}]   ;;  %s1102_s4 = inlined_call_operand.vmem [shape: f32[1,128], index: 4, kind: input, shape index: {}]   ;;  %s1103_s5 = inlined_call_operand.hbm [shape: bf16[128,128], index: 5, kind: input, shape index: {}]   ;;  %s1104_s6 = inlined_call_operand.vmem [shape: bf16[128,128], index: 6, kind: output, shape index: {}]  }
   0x1   :  { %12 = vsyncpa [#allocation5], 0  ;;  %s34_s23 = sshll.u32 %s1101_s3, 4  ;;  %s956_s24 = smov [#allocation4]   ;;  %s35_s23 = int_to_ptr.hbm [resolvable:$true] %s34_s23 }
   0x2   :  { %s36_s25 = sshll.u32 %s956_s24, 4  ;;  %s17_s28 = sshll.u32 %s1098_s0, 4  ;;  %s37_s25 = int_to_ptr.vmem [resolvable:$true] %s36_s25  ;;  %s18_s28 = int_to_ptr.hbm [resolvable:$true] %s17_s28 }
   0x3   :  { %s957_s29 = smov 64   ;;  %s958_s30 = smov 4  }
   0x4   :  { %42 = dma.hbm_to_vmem [thread:$0]  %s35_s23, 1024, %s37_s25, [#allocation5], %s957_s29, %s957_s29, %s958_s30  }
   0x5   :  { %s959_s7 = smov [#allocation2]   ;;  %s49_s11 = sshll.u32 %s1103_s5, 4  ;;  %s50_s11 = int_to_ptr.hbm [resolvable:$true] %s49_s11 }
   0x6   :  { %s19_s8 = sshll.u32 %s959_s7, 4  ;;  %s960_s3 = smov [#allocation6]   ;;  %s20_s8 = int_to_ptr.vmem [resolvable:$true] %s19_s8 }
   0x7   :  { %25 = dma.hbm_to_vmem [thread:$0]  %s18_s28, 1024, %s20_s8, [#allocation3], %s957_s29, %s957_s29, %s958_s30  }
   0x8   :  { %s51_s12 = sshll.u32 %s960_s3, 4  ;;  %s52_s12 = int_to_ptr.vmem [resolvable:$true] %s51_s12 }
   0x9   :  { %57 = dma.hbm_to_vmem [thread:$0]  %s50_s11, 1024, %s52_s12, [#allocation5], %s957_s29, %s957_s29, %s958_s30  }
   0xa   :  { %952 = dma.done.wait [#allocation3], 1024  }
   0xb   :  { %953 = vsyncadd [#allocation3], 4294966272 }
   0xc   :  { %954 = dma.done.wait [#allocation5], 2048  }
   0xd   :  { %955 = vsyncadd [#allocation5], 4294965248  ;;  %v778_v0 = vld [vmem:[%s1099_s1 + $0x38] sm:$0xff]  ;;  %v777_v1 = vld [vmem:[%s1099_s1 + $0x30] sm:$0xff] }
   0xe   :  { %198 = vmatpush.bf16.msra.mxu0 %v778_v0  ;;  %850 = vmatpush.bf16.msra.mxu3 %v778_v0  ;;  %v776_v2 = vld [vmem:[%s1099_s1 + $0x28] sm:$0xff]  ;;  %v775_v3 = vld [vmem:[%s1099_s1 + $0x20] sm:$0xff]  ;;  %v774_v4 = vld [vmem:[%s1099_s1 + $0x18] sm:$0xff] }
   0xf   :  { %v773_v5 = vld [vmem:[%s1099_s1 + $0x10] sm:$0xff]  ;;  %v772_v6 = vld [vmem:[%s1099_s1 + $0x8] sm:$0xff]  ;;  %v771_v7 = vld [vmem:[%s1099_s1] sm:$0xff] }
  0x10   :  { %v763_v8 = vld [vmem:[#allocation2] sm:$0xff]  ;;  %v769_v9 = vld [vmem:[#allocation2 + $0x30] sm:$0xff]  ;;  %v764_v10 = vld [vmem:[#allocation2 + $0x8] sm:$0xff] }
  0x11   :  { %v770_v11 = vld [vmem:[#allocation2 + $0x38] sm:$0xff]  ;;  %v765_v12 = vld [vmem:[#allocation2 + $0x10] sm:$0xff]  ;;  %v800_v18 = vld [vmem:[#allocation6 + $0x28] sm:$0xff] }
  0x12   :  { %199 = vmatpush.bf16.msra.mxu0 %v777_v1  ;;  %851 = vmatpush.bf16.msra.mxu3 %v777_v1  ;;  %v766_v13 = vld [vmem:[#allocation2 + $0x18] sm:$0xff]  ;;  %v801_v16 = vld [vmem:[#allocation6 + $0x30] sm:$0xff]  ;;  %v784_v19 = vld [vmem:[#allocation4 + $0x28] sm:$0xff] }
  0x13   :  { %v802_v14 = vld [vmem:[#allocation6 + $0x38] sm:$0xff]  ;;  %v785_v17 = vld [vmem:[#allocation4 + $0x30] sm:$0xff]  ;;  %v799_v20 = vld [vmem:[#allocation6 + $0x20] sm:$0xff] }
  0x14   :  { %v786_v15 = vld [vmem:[#allocation4 + $0x38] sm:$0xff]  ;;  %399 = vmatpush.bf16.msra.mxu1 %v802_v14  ;;  %v783_v21 = vld [vmem:[#allocation4 + $0x20] sm:$0xff]  ;;  %v797_v25 = vld [vmem:[#allocation6 + $0x10] sm:$0xff] }
  0x15   :  { %496 = vmatpush.bf16.msra.mxu2 %v786_v15  ;;  %v767_v22 = vld [vmem:[#allocation2 + $0x20] sm:$0xff]  ;;  %v798_v23 = vld [vmem:[#allocation6 + $0x18] sm:$0xff]  ;;  %v796_v26 = vld [vmem:[#allocation6 + $0x8] sm:$0xff] }
  0x16   :  { %200 = vmatpush.bf16.msra.mxu0 %v776_v2  ;;  %852 = vmatpush.bf16.msra.mxu3 %v776_v2  ;;  %v782_v24 = vld [vmem:[#allocation4 + $0x18] sm:$0xff]  ;;  %v768_v27 = vld [vmem:[#allocation2 + $0x28] sm:$0xff]  ;;  %v795_v28 = vld [vmem:[#allocation6] sm:$0xff] }
  0x17   :  { %v781_v29 = vld [vmem:[#allocation4 + $0x10] sm:$0xff]  ;;  %v780_v31 = vld [vmem:[#allocation4 + $0x8] sm:$0xff]  ;;  %v779_v32 = vld [vmem:[#allocation4] sm:$0xff] }
  0x18   :  { %400 = vmatpush.bf16.msra.mxu1 %v801_v16  ;;  %v793_v30 = vld [vmem:[%s1100_s2 + $0x30] sm:$0xff]  ;;  %v787_v33 = vld [vmem:[%s1100_s2] sm:$0xff]  ;;  %v794_v34 = vld [vmem:[%s1100_s2 + $0x38] sm:$0xff] }
  0x19   :  { %497 = vmatpush.bf16.msra.mxu2 %v785_v17  ;;  %v788_v35 = vld [vmem:[%s1100_s2 + $0x8] sm:$0xff]  ;;  %v789_v38 = vld [vmem:[%s1100_s2 + $0x10] sm:$0xff]  ;;  %v790_v45 = vld [vmem:[%s1100_s2 + $0x18] sm:$0xff] }
  0x1a   :  { %201 = vmatpush.bf16.msra.mxu0 %v775_v3  ;;  %853 = vmatpush.bf16.msra.mxu3 %v775_v3  ;;  %v791_v51 = vld [vmem:[%s1100_s2 + $0x20] sm:$0xff]  ;;  %v792_v55 = vld [vmem:[%s1100_s2 + $0x28] sm:$0xff] }
  0x1c   :  { %401 = vmatpush.bf16.msra.mxu1 %v800_v18 }
  0x1d   :  { %498 = vmatpush.bf16.msra.mxu2 %v784_v19 }
  0x1e   :  { %202 = vmatpush.bf16.msra.mxu0 %v774_v4  ;;  %854 = vmatpush.bf16.msra.mxu3 %v774_v4 }
  0x20   :  { %402 = vmatpush.bf16.msra.mxu1 %v799_v20 }
  0x21   :  { %499 = vmatpush.bf16.msra.mxu2 %v783_v21 }
  0x22   :  { %203 = vmatpush.bf16.msra.mxu0 %v773_v5  ;;  %855 = vmatpush.bf16.msra.mxu3 %v773_v5 }
  0x24   :  { %403 = vmatpush.bf16.msra.mxu1 %v798_v23 }
  0x25   :  { %500 = vmatpush.bf16.msra.mxu2 %v782_v24 }
  0x26   :  { %204 = vmatpush.bf16.msra.mxu0 %v772_v6  ;;  %856 = vmatpush.bf16.msra.mxu3 %v772_v6 }
  0x28   :  { %404 = vmatpush.bf16.msra.mxu1 %v797_v25 }
  0x29   :  { %501 = vmatpush.bf16.msra.mxu2 %v781_v29 }
  0x2a   :  { %205 = vmatpush.bf16.msra.mxu0 %v771_v7  ;;  %857 = vmatpush.bf16.msra.mxu3 %v771_v7 }
  0x2c   :  { %405 = vmatpush.bf16.msra.mxu1 %v796_v26 }
  0x2d   :  { %206 = vmatmul.bf16.vlgmr.msra.gmra.mxu0 %v763_v8  ;;  %236 = vmatmul.bf16.vlgmr.msra.gmra.mxu3 %v769_v9 }
  0x2e   :  { %858 = vmatpush.bf16.msrb.mxu3 %v802_v14  ;;  %502 = vmatpush.bf16.msra.mxu2 %v780_v31 }
  0x30   :  { %406 = vmatpush.bf16.msra.mxu1 %v795_v28 }
  0x32   :  { %859 = vmatpush.bf16.msrb.mxu3 %v801_v16  ;;  %503 = vmatpush.bf16.msra.mxu2 %v779_v32 }
  0x33   :  { %407 = vmatmul.bf16.vlgmr.msra.gmra.mxu1 %v787_v33 }
  0x36   :  { %860 = vmatpush.bf16.msrb.mxu3 %v800_v18 }
  0x3a   :  { %861 = vmatpush.bf16.msrb.mxu3 %v799_v20 }
  0x3d   :  { %211 = vmatmul.bf16.gmra.mxu0 %v764_v10  ;;  %241 = vmatmul.bf16.gmra.mxu3 %v770_v11  ;;  %v1056_v10 = vld [vmem:[%s1102_s4] ss:$0 sm:$0xff] }
  0x3e   :  { %862 = vmatpush.bf16.msrb.mxu3 %v798_v23 }
  0x42   :  { %863 = vmatpush.bf16.msrb.mxu3 %v797_v25 }
  0x43   :  { %412 = vmatmul.bf16.gmra.mxu1 %v788_v35 }
  0x46   :  { %864 = vmatpush.bf16.msrb.mxu3 %v796_v26 }
  0x4a   :  { %865 = vmatpush.bf16.msrb.mxu3 %v795_v28 }
  0x4d   :  { %216 = vmatmul.bf16.gmra.mxu0 %v765_v12  ;;  %437 = vmatmul.bf16.vlgmr.msrb.gmra.mxu3 %v793_v30 }
  0x4e   :  { %866 = vmatpush.bf16.msra.mxu3 %v786_v15 }
  0x52   :  { %867 = vmatpush.bf16.msra.mxu3 %v785_v17 }
  0x53   :  { %417 = vmatmul.bf16.gmra.mxu1 %v789_v38 }
  0x56   :  { %868 = vmatpush.bf16.msra.mxu3 %v784_v19 }
  0x5a   :  { %869 = vmatpush.bf16.msra.mxu3 %v783_v21 }
  0x5d   :  { %221 = vmatmul.bf16.gmra.mxu0 %v766_v13  ;;  %442 = vmatmul.bf16.gmra.mxu3 %v794_v34 }
  0x5e   :  { %870 = vmatpush.bf16.msra.mxu3 %v782_v24 }
  0x62   :  { %871 = vmatpush.bf16.msra.mxu3 %v781_v29 }
  0x63   :  { %422 = vmatmul.bf16.gmra.mxu1 %v790_v45 }
  0x66   :  { %872 = vmatpush.bf16.msra.mxu3 %v780_v31 }
  0x6a   :  { %873 = vmatpush.bf16.msra.mxu3 %v779_v32 }
  0x6d   :  { %226 = vmatmul.bf16.gmra.mxu0 %v767_v22 }
  0x73   :  { %427 = vmatmul.bf16.gmra.mxu1 %v791_v51 }
  0x7d   :  { %231 = vmatmul.bf16.gmra.mxu0 %v768_v27 }
  0x83   :  { %432 = vmatmul.bf16.gmra.mxu1 %v792_v55 }
  0xaa   :  { %v207_v36 = vpop.f32.mrf.mxu0 }
  0xb0   :  { %v237_v37 = vpop.f32.mrf.mxu3  ;;  %v408_v2 = vpop.f32.mrf.mxu1 }
  0xb2   :  { %v209_v39 = vpop.f32.mrf.mxu0 }
  0xb3   :  { %v247_v40 = vpack.c.bf16 %v209_v39, %v207_v36 }
  0xb5   :  { %504 = vmatmul.bf16.vlgmr.msra.gmra.mxu2 %v247_v40 }
  0xb8   :  { %v239_v41 = vpop.f32.mrf.mxu3  ;;  %v410_v4 = vpop.f32.mrf.mxu1 }
  0xb9   :  { %v253_v42 = vpack.c.bf16 %v239_v41, %v237_v37 }
  0xba   :  { %v212_v43 = vpop.f32.mrf.mxu0 }
  0xbb   :  { %534 = vmatmul.bf16.vlgmr.msra.gmra.mxu3 %v253_v42 }
  0xc0   :  { %v242_v44 = vpop.f32.mrf.mxu3  ;;  %v413_v6 = vpop.f32.mrf.mxu1 }
  0xc2   :  { %v214_v46 = vpop.f32.mrf.mxu0 }
  0xc3   :  { %v248_v47 = vpack.c.bf16 %v214_v46, %v212_v43 }
  0xc5   :  { %509 = vmatmul.bf16.gmra.mxu2 %v248_v47 }
  0xc8   :  { %v244_v48 = vpop.f32.mrf.mxu3  ;;  %v415_v12 = vpop.f32.mrf.mxu1 }
  0xc9   :  { %v254_v49 = vpack.c.bf16 %v244_v48, %v242_v44 }
  0xca   :  { %v217_v50 = vpop.f32.mrf.mxu0 }
  0xcb   :  { %539 = vmatmul.bf16.gmra.mxu3 %v254_v49 }
  0xd0   :  { %v438_v0 = vpop.f32.mrf.mxu3  ;;  %v418_v23 = vpop.f32.mrf.mxu1 }
  0xd2   :  { %v219_v52 = vpop.f32.mrf.mxu0 }
  0xd3   :  { %v249_v53 = vpack.c.bf16 %v219_v52, %v217_v50 }
  0xd5   :  { %514 = vmatmul.bf16.gmra.mxu2 %v249_v53 }
  0xd8   :  { %v440_v1 = vpop.f32.mrf.mxu3  ;;  %v420_v32 = vpop.f32.mrf.mxu1 }
  0xda   :  { %v222_v54 = vpop.f32.mrf.mxu0 }
  0xe0   :  { %v443_v3 = vpop.f32.mrf.mxu3  ;;  %v423_v40 = vpop.f32.mrf.mxu1 }
  0xe2   :  { %v224_v56 = vpop.f32.mrf.mxu0 }
  0xe3   :  { %v250_v57 = vpack.c.bf16 %v224_v56, %v222_v54 }
  0xe5   :  { %519 = vmatmul.bf16.gmra.mxu2 %v250_v57 }
  0xe8   :  { %v445_v5 = vpop.f32.mrf.mxu3  ;;  %v425_v47 = vpop.f32.mrf.mxu1 }
  0xea   :  { %v227_v58 = vpop.f32.mrf.mxu0 }
  0xf0   :  { %v428_v52 = vpop.f32.mrf.mxu1 }
  0xf2   :  { %v229_v59 = vpop.f32.mrf.mxu0 }
  0xf3   :  { %v251_v60 = vpack.c.bf16 %v229_v59, %v227_v58 }
  0xf5   :  { %524 = vmatmul.bf16.gmra.mxu2 %v251_v60 }
  0xf8   :  { %v430_v57 = vpop.f32.mrf.mxu1 }
  0xfa   :  { %v232_v61 = vpop.f32.mrf.mxu0 }
 0x102   :  { %v234_v62 = vpop.f32.mrf.mxu0 }
 0x103   :  { %v252_v63 = vpack.c.bf16 %v234_v62, %v232_v61 }
 0x105   :  { %529 = vmatmul.bf16.gmra.mxu2 %v252_v63 }
 0x138   :  { %v505_v7 = vpop.f32.mrf.mxu2 }
 0x139   :  { %v506_v9 = vadd.f32 %v505_v7, %v408_v2 }
 0x13b   :  { %v549_v14 = vadd.f32 %v1056_v10, %v506_v9 }
 0x13e   :  { %v535_v8 = vpop.f32.mrf.mxu3 }
 0x13f   :  { %v536_v16 = vadd.f32 %v535_v8, %v438_v0  ;;  %v433_v0 = vpop.f32.mrf.mxu1 }
 0x140   :  { %v507_v11 = vpop.f32.mrf.mxu2 }
 0x141   :  { %v508_v13 = vadd.f32 %v507_v11, %v410_v4  ;;  %v561_v19 = vadd.f32 %v1056_v10, %v536_v16 }
 0x143   :  { %v550_v15 = vadd.f32 %v1056_v10, %v508_v13 }
 0x145   :  { %v806_v17 = vpack.c.bf16 %v550_v15, %v549_v14 }
 0x146   :  { %v537_v18 = vpop.f32.mrf.mxu3 }
 0x147   :  { %807 = vst [vmem:[%s1104_s6] sm:$0xff] %v806_v17   ;;  %v538_v20 = vadd.f32 %v537_v18, %v440_v1 }
 0x148   :  { %v510_v21 = vpop.f32.mrf.mxu2 }
 0x149   :  { %v562_v22 = vadd.f32 %v1056_v10, %v538_v20  ;;  %v511_v26 = vadd.f32 %v510_v21, %v413_v6 }
 0x14b   :  { %v836_v24 = vpack.c.bf16 %v562_v22, %v561_v19  ;;  %v551_v29 = vadd.f32 %v1056_v10, %v511_v26 }
 0x14d   :  { %848 = vst [vmem:[%s1104_s6 + $0x30] sm:$0xff] %v836_v24  }
 0x14e   :  { %v540_v25 = vpop.f32.mrf.mxu3 }
 0x14f   :  { %v541_v31 = vadd.f32 %v540_v25, %v443_v3  ;;  %v435_v3 = vpop.f32.mrf.mxu1 }
 0x150   :  { %v512_v27 = vpop.f32.mrf.mxu2 }
 0x151   :  { %v513_v28 = vadd.f32 %v512_v27, %v415_v12  ;;  %v563_v35 = vadd.f32 %v1056_v10, %v541_v31 }
 0x153   :  { %v552_v30 = vadd.f32 %v1056_v10, %v513_v28 }
 0x155   :  { %v811_v33 = vpack.c.bf16 %v552_v30, %v551_v29 }
 0x156   :  { %v542_v34 = vpop.f32.mrf.mxu3 }
 0x157   :  { %843 = vst [vmem:[%s1104_s6 + $0x8] sm:$0xff] %v811_v33   ;;  %v543_v36 = vadd.f32 %v542_v34, %v445_v5 }
 0x158   :  { %v515_v37 = vpop.f32.mrf.mxu2 }
 0x159   :  { %v564_v38 = vadd.f32 %v1056_v10, %v543_v36  ;;  %v516_v41 = vadd.f32 %v515_v37, %v418_v23 }
 0x15b   :  { %v841_v39 = vpack.c.bf16 %v564_v38, %v563_v35  ;;  %v553_v44 = vadd.f32 %v1056_v10, %v516_v41 }
 0x15d   :  { %849 = vst [vmem:[%s1104_s6 + $0x38] sm:$0xff] %v841_v39  }
 0x160   :  { %v517_v42 = vpop.f32.mrf.mxu2 }
 0x161   :  { %v518_v43 = vadd.f32 %v517_v42, %v420_v32 }
 0x163   :  { %v554_v45 = vadd.f32 %v1056_v10, %v518_v43 }
 0x165   :  { %v816_v46 = vpack.c.bf16 %v554_v45, %v553_v44 }
 0x167   :  { %844 = vst [vmem:[%s1104_s6 + $0x10] sm:$0xff] %v816_v46  }
 0x168   :  { %v520_v48 = vpop.f32.mrf.mxu2 }
 0x169   :  { %v521_v49 = vadd.f32 %v520_v48, %v423_v40 }
 0x16b   :  { %v555_v53 = vadd.f32 %v1056_v10, %v521_v49 }
 0x170   :  { %v522_v50 = vpop.f32.mrf.mxu2 }
 0x171   :  { %v523_v51 = vadd.f32 %v522_v50, %v425_v47 }
 0x173   :  { %v556_v54 = vadd.f32 %v1056_v10, %v523_v51 }
 0x175   :  { %v821_v55 = vpack.c.bf16 %v556_v54, %v555_v53 }
 0x177   :  { %845 = vst [vmem:[%s1104_s6 + $0x18] sm:$0xff] %v821_v55  }
 0x178   :  { %v525_v56 = vpop.f32.mrf.mxu2 }
 0x179   :  { %v526_v58 = vadd.f32 %v525_v56, %v428_v52 }
 0x17b   :  { %v557_v61 = vadd.f32 %v1056_v10, %v526_v58 }
 0x180   :  { %v527_v59 = vpop.f32.mrf.mxu2 }
 0x181   :  { %v528_v60 = vadd.f32 %v527_v59, %v430_v57 }
 0x183   :  { %v558_v62 = vadd.f32 %v1056_v10, %v528_v60 }
 0x185   :  { %v826_v63 = vpack.c.bf16 %v558_v62, %v557_v61 }
 0x187   :  { %846 = vst [vmem:[%s1104_s6 + $0x20] sm:$0xff] %v826_v63  }
 0x188   :  { %v530_v1 = vpop.f32.mrf.mxu2 }
 0x189   :  { %v531_v2 = vadd.f32 %v530_v1, %v433_v0 }
 0x18b   :  { %v559_v6 = vadd.f32 %v1056_v10, %v531_v2 }
 0x190   :  { %v532_v4 = vpop.f32.mrf.mxu2 }
 0x191   :  { %v533_v5 = vadd.f32 %v532_v4, %v435_v3 }
 0x193   :  { %v560_v7 = vadd.f32 %v1056_v10, %v533_v5 }
 0x195   :  { %v831_v8 = vpack.c.bf16 %v560_v7, %v559_v6 }
 0x197   :  { %847 = vst [vmem:[%s1104_s6 + $0x28] sm:$0xff] %v831_v8  }
 0x198   :  { %601 = vsyncpa [#allocation3], 1 }
 0x199   :  { %602 = vsyncpa [#allocation5], 1 }

// kernel: model_forward.6
= control target key start
LH: loop header
LB: loop body
LE: loop exit
PB: predicated region body
PF: predicated region fallthrough
CT: control target
= control target key end

     0   :  { %11 = vsyncpa [#allocation3], 0  ;;  %s1094_s0 = inlined_call_operand.hbm [shape: bf16[128,128], index: 0, kind: input, shape index: {}]   ;;  %s1095_s1 = inlined_call_operand.vmem [shape: bf16[128,128], index: 1, kind: input, shape index: {}]   ;;  %s1096_s2 = inlined_call_operand.vmem [shape: bf16[128,128], index: 2, kind: input, shape index: {}]   ;;  %s1097_s3 = inlined_call_operand.vmem [shape: bf16[128,128], index: 3, kind: input, shape index: {}]   ;;  %s1098_s4 = inlined_call_operand.vmem [shape: f32[1,128], index: 4, kind: input, shape index: {}]   ;;  %s1099_s5 = inlined_call_operand.hbm [shape: bf16[128,128], index: 5, kind: input, shape index: {}]   ;;  %s1100_s6 = inlined_call_operand.vmem [shape: bf16[128,128], index: 6, kind: output, shape index: {}]  }
   0x1   :  { %s17_s23 = sshll.u32 %s1094_s0, 4  ;;  %s18_s23 = int_to_ptr.hbm [resolvable:$true] %s17_s23 }
   0x2   :  { %12 = vsyncpa [#allocation5], 0  ;;  %s932_s24 = smov [#allocation2]   ;;  %s38_s28 = sshll.u32 %s1099_s5, 4  ;;  %s39_s28 = int_to_ptr.hbm [resolvable:$true] %s38_s28 }
   0x3   :  { %s19_s25 = sshll.u32 %s932_s24, 4  ;;  %s933_s29 = smov 64   ;;  %s20_s25 = int_to_ptr.vmem [resolvable:$true] %s19_s25 }
   0x4   :  { %s934_s30 = smov 4   ;;  %s935_s7 = smov [#allocation4]  }
   0x5   :  { %25 = dma.hbm_to_vmem [thread:$0]  %s18_s23, 1024, %s20_s25, [#allocation3], %s933_s29, %s933_s29, %s934_s30  }
   0x6   :  { %s40_s8 = sshll.u32 %s935_s7, 4  ;;  %s41_s8 = int_to_ptr.vmem [resolvable:$true] %s40_s8 }
   0x7   :  { %46 = dma.hbm_to_vmem [thread:$0]  %s39_s28, 1024, %s41_s8, [#allocation5], %s933_s29, %s933_s29, %s934_s30  }
   0x8   :  { %928 = dma.done.wait [#allocation3], 1024  }
   0x9   :  { %929 = vsyncadd [#allocation3], 4294966272 }
   0xa   :  { %930 = dma.done.wait [#allocation5], 1024  }
   0xb   :  { %931 = vsyncadd [#allocation5], 4294966272  ;;  %v779_v0 = vld [vmem:[%s1095_s1 + $0x38] sm:$0xff]  ;;  %v778_v1 = vld [vmem:[%s1095_s1 + $0x30] sm:$0xff] }
   0xc   :  { %183 = vmatpush.bf16.msra.mxu0 %v779_v0  ;;  %851 = vmatpush.bf16.msra.mxu3 %v779_v0  ;;  %v777_v2 = vld [vmem:[%s1095_s1 + $0x28] sm:$0xff]  ;;  %v776_v3 = vld [vmem:[%s1095_s1 + $0x20] sm:$0xff]  ;;  %v775_v4 = vld [vmem:[%s1095_s1 + $0x18] sm:$0xff] }
   0xd   :  { %v774_v5 = vld [vmem:[%s1095_s1 + $0x10] sm:$0xff]  ;;  %v773_v6 = vld [vmem:[%s1095_s1 + $0x8] sm:$0xff]  ;;  %v772_v7 = vld [vmem:[%s1095_s1] sm:$0xff] }
   0xe   :  { %v764_v8 = vld [vmem:[#allocation2] sm:$0xff]  ;;  %v770_v9 = vld [vmem:[#allocation2 + $0x30] sm:$0xff]  ;;  %v765_v10 = vld [vmem:[#allocation2 + $0x8] sm:$0xff] }
   0xf   :  { %v771_v11 = vld [vmem:[#allocation2 + $0x38] sm:$0xff]  ;;  %v766_v12 = vld [vmem:[#allocation2 + $0x10] sm:$0xff]  ;;  %v801_v18 = vld [vmem:[#allocation4 + $0x28] sm:$0xff] }
  0x10   :  { %184 = vmatpush.bf16.msra.mxu0 %v778_v1  ;;  %852 = vmatpush.bf16.msra.mxu3 %v778_v1  ;;  %v767_v13 = vld [vmem:[#allocation2 + $0x18] sm:$0xff]  ;;  %v802_v16 = vld [vmem:[#allocation4 + $0x30] sm:$0xff]  ;;  %v785_v19 = vld [vmem:[%s1097_s3 + $0x28] sm:$0xff] }
  0x11   :  { %v803_v14 = vld [vmem:[#allocation4 + $0x38] sm:$0xff]  ;;  %v786_v17 = vld [vmem:[%s1097_s3 + $0x30] sm:$0xff]  ;;  %v800_v20 = vld [vmem:[#allocation4 + $0x20] sm:$0xff] }
  0x12   :  { %v787_v15 = vld [vmem:[%s1097_s3 + $0x38] sm:$0xff]  ;;  %384 = vmatpush.bf16.msra.mxu1 %v803_v14  ;;  %v784_v21 = vld [vmem:[%s1097_s3 + $0x20] sm:$0xff]  ;;  %v798_v25 = vld [vmem:[#allocation4 + $0x10] sm:$0xff] }
  0x13   :  { %481 = vmatpush.bf16.msra.mxu2 %v787_v15  ;;  %v768_v22 = vld [vmem:[#allocation2 + $0x20] sm:$0xff]  ;;  %v799_v23 = vld [vmem:[#allocation4 + $0x18] sm:$0xff]  ;;  %v797_v26 = vld [vmem:[#allocation4 + $0x8] sm:$0xff] }
  0x14   :  { %185 = vmatpush.bf16.msra.mxu0 %v777_v2  ;;  %853 = vmatpush.bf16.msra.mxu3 %v777_v2  ;;  %v783_v24 = vld [vmem:[%s1097_s3 + $0x18] sm:$0xff]  ;;  %v769_v27 = vld [vmem:[#allocation2 + $0x28] sm:$0xff]  ;;  %v796_v28 = vld [vmem:[#allocation4] sm:$0xff] }
  0x15   :  { %v782_v29 = vld [vmem:[%s1097_s3 + $0x10] sm:$0xff]  ;;  %v781_v31 = vld [vmem:[%s1097_s3 + $0x8] sm:$0xff]  ;;  %v780_v32 = vld [vmem:[%s1097_s3] sm:$0xff] }
  0x16   :  { %385 = vmatpush.bf16.msra.mxu1 %v802_v16  ;;  %v794_v30 = vld [vmem:[%s1096_s2 + $0x30] sm:$0xff]  ;;  %v788_v33 = vld [vmem:[%s1096_s2] sm:$0xff]  ;;  %v795_v34 = vld [vmem:[%s1096_s2 + $0x38] sm:$0xff] }
  0x17   :  { %482 = vmatpush.bf16.msra.mxu2 %v786_v17  ;;  %v789_v35 = vld [vmem:[%s1096_s2 + $0x8] sm:$0xff]  ;;  %v790_v38 = vld [vmem:[%s1096_s2 + $0x10] sm:$0xff]  ;;  %v791_v45 = vld [vmem:[%s1096_s2 + $0x18] sm:$0xff] }
  0x18   :  { %186 = vmatpush.bf16.msra.mxu0 %v776_v3  ;;  %854 = vmatpush.bf16.msra.mxu3 %v776_v3  ;;  %v792_v51 = vld [vmem:[%s1096_s2 + $0x20] sm:$0xff]  ;;  %v793_v55 = vld [vmem:[%s1096_s2 + $0x28] sm:$0xff] }
  0x1a   :  { %386 = vmatpush.bf16.msra.mxu1 %v801_v18 }
  0x1b   :  { %483 = vmatpush.bf16.msra.mxu2 %v785_v19 }
  0x1c   :  { %187 = vmatpush.bf16.msra.mxu0 %v775_v4  ;;  %855 = vmatpush.bf16.msra.mxu3 %v775_v4 }
  0x1e   :  { %387 = vmatpush.bf16.msra.mxu1 %v800_v20 }
  0x1f   :  { %484 = vmatpush.bf16.msra.mxu2 %v784_v21 }
  0x20   :  { %188 = vmatpush.bf16.msra.mxu0 %v774_v5  ;;  %856 = vmatpush.bf16.msra.mxu3 %v774_v5 }
  0x22   :  { %388 = vmatpush.bf16.msra.mxu1 %v799_v23 }
  0x23   :  { %485 = vmatpush.bf16.msra.mxu2 %v783_v24 }
  0x24   :  { %189 = vmatpush.bf16.msra.mxu0 %v773_v6  ;;  %857 = vmatpush.bf16.msra.mxu3 %v773_v6 }
  0x26   :  { %389 = vmatpush.bf16.msra.mxu1 %v798_v25 }
  0x27   :  { %486 = vmatpush.bf16.msra.mxu2 %v782_v29 }
  0x28   :  { %190 = vmatpush.bf16.msra.mxu0 %v772_v7  ;;  %858 = vmatpush.bf16.msra.mxu3 %v772_v7 }
  0x2a   :  { %390 = vmatpush.bf16.msra.mxu1 %v797_v26 }
  0x2b   :  { %191 = vmatmul.bf16.vlgmr.msra.gmra.mxu0 %v764_v8  ;;  %221 = vmatmul.bf16.vlgmr.msra.gmra.mxu3 %v770_v9  ;;  %v1052_v9 = vld [vmem:[%s1098_s4] ss:$0 sm:$0xff] }
  0x2c   :  { %859 = vmatpush.bf16.msrb.mxu3 %v803_v14  ;;  %487 = vmatpush.bf16.msra.mxu2 %v781_v31 }
  0x2e   :  { %391 = vmatpush.bf16.msra.mxu1 %v796_v28 }
  0x30   :  { %860 = vmatpush.bf16.msrb.mxu3 %v802_v16  ;;  %488 = vmatpush.bf16.msra.mxu2 %v780_v32 }
  0x31   :  { %392 = vmatmul.bf16.vlgmr.msra.gmra.mxu1 %v788_v33 }
  0x34   :  { %861 = vmatpush.bf16.msrb.mxu3 %v801_v18 }
  0x38   :  { %862 = vmatpush.bf16.msrb.mxu3 %v800_v20 }
  0x3b   :  { %196 = vmatmul.bf16.gmra.mxu0 %v765_v10  ;;  %226 = vmatmul.bf16.gmra.mxu3 %v771_v11 }
  0x3c   :  { %863 = vmatpush.bf16.msrb.mxu3 %v799_v23 }
  0x40   :  { %864 = vmatpush.bf16.msrb.mxu3 %v798_v25 }
  0x41   :  { %397 = vmatmul.bf16.gmra.mxu1 %v789_v35 }
  0x44   :  { %865 = vmatpush.bf16.msrb.mxu3 %v797_v26 }
  0x48   :  { %866 = vmatpush.bf16.msrb.mxu3 %v796_v28 }
  0x4b   :  { %201 = vmatmul.bf16.gmra.mxu0 %v766_v12  ;;  %422 = vmatmul.bf16.vlgmr.msrb.gmra.mxu3 %v794_v30 }
  0x4c   :  { %867 = vmatpush.bf16.msra.mxu3 %v787_v15 }
  0x50   :  { %868 = vmatpush.bf16.msra.mxu3 %v786_v17 }
  0x51   :  { %402 = vmatmul.bf16.gmra.mxu1 %v790_v38 }
  0x54   :  { %869 = vmatpush.bf16.msra.mxu3 %v785_v19 }
  0x58   :  { %870 = vmatpush.bf16.msra.mxu3 %v784_v21 }
  0x5b   :  { %206 = vmatmul.bf16.gmra.mxu0 %v767_v13  ;;  %427 = vmatmul.bf16.gmra.mxu3 %v795_v34 }
  0x5c   :  { %871 = vmatpush.bf16.msra.mxu3 %v783_v24 }
  0x60   :  { %872 = vmatpush.bf16.msra.mxu3 %v782_v29 }
  0x61   :  { %407 = vmatmul.bf16.gmra.mxu1 %v791_v45 }
  0x64   :  { %873 = vmatpush.bf16.msra.mxu3 %v781_v31 }
  0x68   :  { %874 = vmatpush.bf16.msra.mxu3 %v780_v32 }
  0x6b   :  { %211 = vmatmul.bf16.gmra.mxu0 %v768_v22 }
  0x71   :  { %412 = vmatmul.bf16.gmra.mxu1 %v792_v51 }
  0x7b   :  { %216 = vmatmul.bf16.gmra.mxu0 %v769_v27 }
  0x81   :  { %417 = vmatmul.bf16.gmra.mxu1 %v793_v55 }
  0xa8   :  { %v192_v36 = vpop.f32.mrf.mxu0 }
  0xae   :  { %v222_v37 = vpop.f32.mrf.mxu3  ;;  %v393_v2 = vpop.f32.mrf.mxu1 }
  0xb0   :  { %v194_v39 = vpop.f32.mrf.mxu0 }
  0xb1   :  { %v232_v40 = vpack.c.bf16 %v194_v39, %v192_v36 }
  0xb3   :  { %489 = vmatmul.bf16.vlgmr.msra.gmra.mxu2 %v232_v40 }
  0xb6   :  { %v224_v41 = vpop.f32.mrf.mxu3  ;;  %v395_v4 = vpop.f32.mrf.mxu1 }
  0xb7   :  { %v238_v42 = vpack.c.bf16 %v224_v41, %v222_v37 }
  0xb8   :  { %v197_v43 = vpop.f32.mrf.mxu0 }
  0xb9   :  { %519 = vmatmul.bf16.vlgmr.msra.gmra.mxu3 %v238_v42 }
  0xbe   :  { %v227_v44 = vpop.f32.mrf.mxu3  ;;  %v398_v6 = vpop.f32.mrf.mxu1 }
  0xc0   :  { %v199_v46 = vpop.f32.mrf.mxu0 }
  0xc1   :  { %v233_v47 = vpack.c.bf16 %v199_v46, %v197_v43 }
  0xc3   :  { %494 = vmatmul.bf16.gmra.mxu2 %v233_v47 }
  0xc6   :  { %v229_v48 = vpop.f32.mrf.mxu3  ;;  %v400_v12 = vpop.f32.mrf.mxu1 }
  0xc7   :  { %v239_v49 = vpack.c.bf16 %v229_v48, %v227_v44 }
  0xc8   :  { %v202_v50 = vpop.f32.mrf.mxu0 }
  0xc9   :  { %524 = vmatmul.bf16.gmra.mxu3 %v239_v49 }
  0xce   :  { %v423_v0 = vpop.f32.mrf.mxu3  ;;  %v403_v26 = vpop.f32.mrf.mxu1 }
  0xd0   :  { %v204_v52 = vpop.f32.mrf.mxu0 }
  0xd1   :  { %v234_v53 = vpack.c.bf16 %v204_v52, %v202_v50 }
  0xd3   :  { %499 = vmatmul.bf16.gmra.mxu2 %v234_v53 }
  0xd6   :  { %v425_v1 = vpop.f32.mrf.mxu3  ;;  %v405_v36 = vpop.f32.mrf.mxu1 }
  0xd8   :  { %v207_v54 = vpop.f32.mrf.mxu0 }
  0xde   :  { %v428_v3 = vpop.f32.mrf.mxu3  ;;  %v408_v49 = vpop.f32.mrf.mxu1 }
  0xe0   :  { %v209_v56 = vpop.f32.mrf.mxu0 }
  0xe1   :  { %v235_v57 = vpack.c.bf16 %v209_v56, %v207_v54 }
  0xe3   :  { %504 = vmatmul.bf16.gmra.mxu2 %v235_v57 }
  0xe6   :  { %v430_v5 = vpop.f32.mrf.mxu3  ;;  %v410_v57 = vpop.f32.mrf.mxu1 }
  0xe8   :  { %v212_v58 = vpop.f32.mrf.mxu0 }
  0xf0   :  { %v214_v59 = vpop.f32.mrf.mxu0 }
  0xf1   :  { %v236_v60 = vpack.c.bf16 %v214_v59, %v212_v58 }
  0xf3   :  { %509 = vmatmul.bf16.gmra.mxu2 %v236_v60 }
  0xf8   :  { %v217_v61 = vpop.f32.mrf.mxu0 }
 0x100   :  { %v219_v62 = vpop.f32.mrf.mxu0 }
 0x101   :  { %v237_v63 = vpack.c.bf16 %v219_v62, %v217_v61 }
 0x103   :  { %514 = vmatmul.bf16.gmra.mxu2 %v237_v63  ;;  %v413_v63 = vpop.f32.mrf.mxu1 }
 0x136   :  { %v490_v7 = vpop.f32.mrf.mxu2 }
 0x137   :  { %v491_v8 = vadd.f32 %v490_v7, %v393_v2 }
 0x139   :  { %v534_v13 = vadd.f32 %v1052_v9, %v491_v8 }
 0x13b   :  { %v550_v17 = vmax.f32 %v534_v13, 0.0 }
 0x13c   :  { %v520_v10 = vpop.f32.mrf.mxu3 }
 0x13d   :  { %v521_v15 = vadd.f32 %v520_v10, %v423_v0 }
 0x13e   :  { %v492_v11 = vpop.f32.mrf.mxu2 }
 0x13f   :  { %v493_v14 = vadd.f32 %v492_v11, %v395_v4  ;;  %v546_v19 = vadd.f32 %v1052_v9, %v521_v15 }
 0x141   :  { %v535_v16 = vadd.f32 %v1052_v9, %v493_v14  ;;  %v562_v24 = vmax.f32 %v546_v19, 0.0 }
 0x143   :  { %v551_v18 = vmax.f32 %v535_v16, 0.0 }
 0x144   :  { %v522_v20 = vpop.f32.mrf.mxu3 }
 0x145   :  { %v807_v21 = vpack.c.bf16 %v551_v18, %v550_v17  ;;  %v523_v22 = vadd.f32 %v522_v20, %v425_v1 }
 0x146   :  { %v495_v23 = vpop.f32.mrf.mxu2 }
 0x147   :  { %808 = vst [vmem:[%s1100_s6] sm:$0xff] %v807_v21   ;;  %v547_v25 = vadd.f32 %v1052_v9, %v523_v22  ;;  %v496_v28 = vadd.f32 %v495_v23, %v398_v6 }
 0x149   :  { %v563_v27 = vmax.f32 %v547_v25, 0.0  ;;  %v536_v32 = vadd.f32 %v1052_v9, %v496_v28 }
 0x14b   :  { %v837_v29 = vpack.c.bf16 %v563_v27, %v562_v24  ;;  %v552_v37 = vmax.f32 %v536_v32, 0.0 }
 0x14c   :  { %v525_v30 = vpop.f32.mrf.mxu3 }
 0x14d   :  { %849 = vst [vmem:[%s1100_s6 + $0x30] sm:$0xff] %v837_v29   ;;  %v526_v34 = vadd.f32 %v525_v30, %v428_v3 }
 0x14e   :  { %v497_v31 = vpop.f32.mrf.mxu2 }
 0x14f   :  { %v498_v33 = vadd.f32 %v497_v31, %v400_v12  ;;  %v548_v39 = vadd.f32 %v1052_v9, %v526_v34 }
 0x151   :  { %v537_v35 = vadd.f32 %v1052_v9, %v498_v33  ;;  %v564_v44 = vmax.f32 %v548_v39, 0.0 }
 0x153   :  { %v553_v38 = vmax.f32 %v537_v35, 0.0 }
 0x154   :  { %v527_v40 = vpop.f32.mrf.mxu3 }
 0x155   :  { %v812_v41 = vpack.c.bf16 %v553_v38, %v552_v37  ;;  %v528_v42 = vadd.f32 %v527_v40, %v430_v5  ;;  %v415_v5 = vpop.f32.mrf.mxu1 }
 0x156   :  { %v500_v43 = vpop.f32.mrf.mxu2 }
 0x157   :  { %844 = vst [vmem:[%s1100_s6 + $0x8] sm:$0xff] %v812_v41   ;;  %v549_v45 = vadd.f32 %v1052_v9, %v528_v42  ;;  %v501_v47 = vadd.f32 %v500_v43, %v403_v26 }
 0x159   :  { %v565_v46 = vmax.f32 %v549_v45, 0.0  ;;  %v538_v51 = vadd.f32 %v1052_v9, %v501_v47 }
 0x15b   :  { %v842_v48 = vpack.c.bf16 %v565_v46, %v564_v44  ;;  %v554_v54 = vmax.f32 %v538_v51, 0.0 }
 0x15d   :  { %850 = vst [vmem:[%s1100_s6 + $0x38] sm:$0xff] %v842_v48   ;;  %v418_v14 = vpop.f32.mrf.mxu1 }
 0x15e   :  { %v502_v50 = vpop.f32.mrf.mxu2 }
 0x15f   :  { %v503_v52 = vadd.f32 %v502_v50, %v405_v36 }
 0x161   :  { %v539_v53 = vadd.f32 %v1052_v9, %v503_v52 }
 0x163   :  { %v555_v55 = vmax.f32 %v539_v53, 0.0 }
 0x165   :  { %v817_v56 = vpack.c.bf16 %v555_v55, %v554_v54  ;;  %v420_v18 = vpop.f32.mrf.mxu1 }
 0x166   :  { %v505_v58 = vpop.f32.mrf.mxu2 }
 0x167   :  { %845 = vst [vmem:[%s1100_s6 + $0x10] sm:$0xff] %v817_v56   ;;  %v506_v59 = vadd.f32 %v505_v58, %v408_v49 }
 0x169   :  { %v540_v61 = vadd.f32 %v1052_v9, %v506_v59 }
 0x16b   :  { %v556_v1 = vmax.f32 %v540_v61, 0.0 }
 0x16e   :  { %v507_v60 = vpop.f32.mrf.mxu2 }
 0x16f   :  { %v508_v62 = vadd.f32 %v507_v60, %v410_v57 }
 0x171   :  { %v541_v0 = vadd.f32 %v1052_v9, %v508_v62 }
 0x173   :  { %v557_v2 = vmax.f32 %v541_v0, 0.0 }
 0x175   :  { %v822_v3 = vpack.c.bf16 %v557_v2, %v556_v1 }
 0x176   :  { %v510_v4 = vpop.f32.mrf.mxu2 }
 0x177   :  { %846 = vst [vmem:[%s1100_s6 + $0x18] sm:$0xff] %v822_v3   ;;  %v511_v6 = vadd.f32 %v510_v4, %v413_v63 }
 0x179   :  { %v542_v8 = vadd.f32 %v1052_v9, %v511_v6 }
 0x17b   :  { %v558_v12 = vmax.f32 %v542_v8, 0.0 }
 0x17e   :  { %v512_v7 = vpop.f32.mrf.mxu2 }
 0x17f   :  { %v513_v10 = vadd.f32 %v512_v7, %v415_v5 }
 0x181   :  { %v543_v11 = vadd.f32 %v1052_v9, %v513_v10 }
 0x183   :  { %v559_v13 = vmax.f32 %v543_v11, 0.0 }
 0x185   :  { %v827_v15 = vpack.c.bf16 %v559_v13, %v558_v12 }
 0x186   :  { %v515_v16 = vpop.f32.mrf.mxu2 }
 0x187   :  { %847 = vst [vmem:[%s1100_s6 + $0x20] sm:$0xff] %v827_v15   ;;  %v516_v17 = vadd.f32 %v515_v16, %v418_v14 }
 0x189   :  { %v544_v20 = vadd.f32 %v1052_v9, %v516_v17 }
 0x18b   :  { %v560_v23 = vmax.f32 %v544_v20, 0.0 }
 0x18e   :  { %v517_v19 = vpop.f32.mrf.mxu2 }
 0x18f   :  { %v518_v21 = vadd.f32 %v517_v19, %v420_v18 }
 0x191   :  { %v545_v22 = vadd.f32 %v1052_v9, %v518_v21 }
 0x193   :  { %v561_v24 = vmax.f32 %v545_v22, 0.0 }
 0x195   :  { %v832_v25 = vpack.c.bf16 %v561_v24, %v560_v23 }
 0x197   :  { %848 = vst [vmem:[%s1100_s6 + $0x28] sm:$0xff] %v832_v25  }
 0x198   :  { %602 = vsyncpa [#allocation3], 1 }
 0x199   :  { %603 = vsyncpa [#allocation5], 1 }

// kernel: model_forward.5
= control target key start
LH: loop header
LB: loop body
LE: loop exit
PB: predicated region body
PF: predicated region fallthrough
CT: control target
= control target key end

     0   :  { %11 = vsyncpa [#allocation3], 0  ;;  %s888_s24 = smov [#allocation2]   ;;  %s889_s26 = smov 64   ;;  %s1070_s0 = inlined_call_operand.hbm [shape: bf16[128,128], index: 0, kind: input, shape index: {}]   ;;  %s1071_s1 = inlined_call_operand.vmem [shape: bf16[128,128], index: 1, kind: input, shape index: {}]   ;;  %s1072_s2 = inlined_call_operand.vmem [shape: bf16[128,128], index: 2, kind: input, shape index: {}]   ;;  %s1073_s3 = inlined_call_operand.vmem [shape: bf16[128,128], index: 3, kind: input, shape index: {}]   ;;  %s1074_s4 = inlined_call_operand.vmem [shape: f32[1,128], index: 4, kind: input, shape index: {}]   ;;  %s1075_s5 = inlined_call_operand.vmem [shape: bf16[128,128], index: 5, kind: input, shape index: {}]   ;;  %s1076_s6 = inlined_call_operand.vmem [shape: bf16[128,128], index: 6, kind: output, shape index: {}]  }
   0x1   :  { %s16_s23 = sshll.u32 %s1070_s0, 4  ;;  %s18_s25 = sshll.u32 %s888_s24, 4  ;;  %s17_s23 = int_to_ptr.hbm [resolvable:$true] %s16_s23  ;;  %s19_s25 = int_to_ptr.vmem [resolvable:$true] %s18_s25 }
   0x2   :  { %s890_s27 = smov 4  }
   0x3   :  { %24 = dma.hbm_to_vmem [thread:$0]  %s17_s23, 1024, %s19_s25, [#allocation3], %s889_s26, %s889_s26, %s890_s27  }
   0x4   :  { %886 = dma.done.wait [#allocation3], 1024  }
   0x5   :  { %887 = vsyncadd [#allocation3], 4294966272  ;;  %v762_v0 = vld [vmem:[%s1071_s1 + $0x38] sm:$0xff]  ;;  %v761_v1 = vld [vmem:[%s1071_s1 + $0x30] sm:$0xff] }
   0x6   :  { %167 = vmatpush.bf16.msra.mxu0 %v762_v0  ;;  %834 = vmatpush.bf16.msra.mxu3 %v762_v0  ;;  %v760_v2 = vld [vmem:[%s1071_s1 + $0x28] sm:$0xff]  ;;  %v759_v3 = vld [vmem:[%s1071_s1 + $0x20] sm:$0xff]  ;;  %v758_v4 = vld [vmem:[%s1071_s1 + $0x18] sm:$0xff] }
   0x7   :  { %v757_v5 = vld [vmem:[%s1071_s1 + $0x10] sm:$0xff]  ;;  %v756_v6 = vld [vmem:[%s1071_s1 + $0x8] sm:$0xff]  ;;  %v755_v7 = vld [vmem:[%s1071_s1] sm:$0xff] }
   0x8   :  { %v747_v8 = vld [vmem:[#allocation2] sm:$0xff]  ;;  %v753_v9 = vld [vmem:[#allocation2 + $0x30] sm:$0xff]  ;;  %v748_v10 = vld [vmem:[#allocation2 + $0x8] sm:$0xff] }
   0x9   :  { %v754_v11 = vld [vmem:[#allocation2 + $0x38] sm:$0xff]  ;;  %v749_v12 = vld [vmem:[#allocation2 + $0x10] sm:$0xff]  ;;  %v784_v18 = vld [vmem:[%s1075_s5 + $0x28] sm:$0xff] }
   0xa   :  { %168 = vmatpush.bf16.msra.mxu0 %v761_v1  ;;  %835 = vmatpush.bf16.msra.mxu3 %v761_v1  ;;  %v750_v13 = vld [vmem:[#allocation2 + $0x18] sm:$0xff]  ;;  %v785_v16 = vld [vmem:[%s1075_s5 + $0x30] sm:$0xff]  ;;  %v768_v19 = vld [vmem:[%s1073_s3 + $0x28] sm:$0xff] }
   0xb   :  { %v786_v14 = vld [vmem:[%s1075_s5 + $0x38] sm:$0xff]  ;;  %v769_v17 = vld [vmem:[%s1073_s3 + $0x30] sm:$0xff]  ;;  %v783_v20 = vld [vmem:[%s1075_s5 + $0x20] sm:$0xff] }
   0xc   :  { %v770_v15 = vld [vmem:[%s1073_s3 + $0x38] sm:$0xff]  ;;  %368 = vmatpush.bf16.msra.mxu1 %v786_v14  ;;  %v767_v21 = vld [vmem:[%s1073_s3 + $0x20] sm:$0xff]  ;;  %v781_v25 = vld [vmem:[%s1075_s5 + $0x10] sm:$0xff] }
   0xd   :  { %465 = vmatpush.bf16.msra.mxu2 %v770_v15  ;;  %v751_v22 = vld [vmem:[#allocation2 + $0x20] sm:$0xff]  ;;  %v782_v23 = vld [vmem:[%s1075_s5 + $0x18] sm:$0xff]  ;;  %v780_v26 = vld [vmem:[%s1075_s5 + $0x8] sm:$0xff] }
   0xe   :  { %169 = vmatpush.bf16.msra.mxu0 %v760_v2  ;;  %836 = vmatpush.bf16.msra.mxu3 %v760_v2  ;;  %v766_v24 = vld [vmem:[%s1073_s3 + $0x18] sm:$0xff]  ;;  %v752_v27 = vld [vmem:[#allocation2 + $0x28] sm:$0xff]  ;;  %v779_v28 = vld [vmem:[%s1075_s5] sm:$0xff] }
   0xf   :  { %v765_v29 = vld [vmem:[%s1073_s3 + $0x10] sm:$0xff]  ;;  %v764_v31 = vld [vmem:[%s1073_s3 + $0x8] sm:$0xff]  ;;  %v763_v32 = vld [vmem:[%s1073_s3] sm:$0xff] }
  0x10   :  { %369 = vmatpush.bf16.msra.mxu1 %v785_v16  ;;  %v777_v30 = vld [vmem:[%s1072_s2 + $0x30] sm:$0xff]  ;;  %v771_v33 = vld [vmem:[%s1072_s2] sm:$0xff]  ;;  %v778_v34 = vld [vmem:[%s1072_s2 + $0x38] sm:$0xff] }
  0x11   :  { %466 = vmatpush.bf16.msra.mxu2 %v769_v17  ;;  %v772_v35 = vld [vmem:[%s1072_s2 + $0x8] sm:$0xff]  ;;  %v773_v38 = vld [vmem:[%s1072_s2 + $0x10] sm:$0xff]  ;;  %v774_v45 = vld [vmem:[%s1072_s2 + $0x18] sm:$0xff] }
  0x12   :  { %170 = vmatpush.bf16.msra.mxu0 %v759_v3  ;;  %837 = vmatpush.bf16.msra.mxu3 %v759_v3  ;;  %v775_v51 = vld [vmem:[%s1072_s2 + $0x20] sm:$0xff]  ;;  %v776_v55 = vld [vmem:[%s1072_s2 + $0x28] sm:$0xff] }
  0x14   :  { %370 = vmatpush.bf16.msra.mxu1 %v784_v18 }
  0x15   :  { %467 = vmatpush.bf16.msra.mxu2 %v768_v19 }
  0x16   :  { %171 = vmatpush.bf16.msra.mxu0 %v758_v4  ;;  %838 = vmatpush.bf16.msra.mxu3 %v758_v4 }
  0x18   :  { %371 = vmatpush.bf16.msra.mxu1 %v783_v20 }
  0x19   :  { %468 = vmatpush.bf16.msra.mxu2 %v767_v21 }
  0x1a   :  { %172 = vmatpush.bf16.msra.mxu0 %v757_v5  ;;  %839 = vmatpush.bf16.msra.mxu3 %v757_v5 }
  0x1c   :  { %372 = vmatpush.bf16.msra.mxu1 %v782_v23 }
  0x1d   :  { %469 = vmatpush.bf16.msra.mxu2 %v766_v24 }
  0x1e   :  { %173 = vmatpush.bf16.msra.mxu0 %v756_v6  ;;  %840 = vmatpush.bf16.msra.mxu3 %v756_v6 }
  0x20   :  { %373 = vmatpush.bf16.msra.mxu1 %v781_v25 }
  0x21   :  { %470 = vmatpush.bf16.msra.mxu2 %v765_v29 }
  0x22   :  { %174 = vmatpush.bf16.msra.mxu0 %v755_v7  ;;  %841 = vmatpush.bf16.msra.mxu3 %v755_v7 }
  0x24   :  { %374 = vmatpush.bf16.msra.mxu1 %v780_v26 }
  0x25   :  { %175 = vmatmul.bf16.vlgmr.msra.gmra.mxu0 %v747_v8  ;;  %205 = vmatmul.bf16.vlgmr.msra.gmra.mxu3 %v753_v9  ;;  %v1028_v9 = vld [vmem:[%s1074_s4] ss:$0 sm:$0xff] }
  0x26   :  { %842 = vmatpush.bf16.msrb.mxu3 %v786_v14  ;;  %471 = vmatpush.bf16.msra.mxu2 %v764_v31 }
  0x28   :  { %375 = vmatpush.bf16.msra.mxu1 %v779_v28 }
  0x2a   :  { %843 = vmatpush.bf16.msrb.mxu3 %v785_v16  ;;  %472 = vmatpush.bf16.msra.mxu2 %v763_v32 }
  0x2b   :  { %376 = vmatmul.bf16.vlgmr.msra.gmra.mxu1 %v771_v33 }
  0x2e   :  { %844 = vmatpush.bf16.msrb.mxu3 %v784_v18 }
  0x32   :  { %845 = vmatpush.bf16.msrb.mxu3 %v783_v20 }
  0x35   :  { %180 = vmatmul.bf16.gmra.mxu0 %v748_v10  ;;  %210 = vmatmul.bf16.gmra.mxu3 %v754_v11 }
  0x36   :  { %846 = vmatpush.bf16.msrb.mxu3 %v782_v23 }
  0x3a   :  { %847 = vmatpush.bf16.msrb.mxu3 %v781_v25 }
  0x3b   :  { %381 = vmatmul.bf16.gmra.mxu1 %v772_v35 }
  0x3e   :  { %848 = vmatpush.bf16.msrb.mxu3 %v780_v26 }
  0x42   :  { %849 = vmatpush.bf16.msrb.mxu3 %v779_v28 }
  0x45   :  { %185 = vmatmul.bf16.gmra.mxu0 %v749_v12  ;;  %406 = vmatmul.bf16.vlgmr.msrb.gmra.mxu3 %v777_v30 }
  0x46   :  { %850 = vmatpush.bf16.msra.mxu3 %v770_v15 }
  0x4a   :  { %851 = vmatpush.bf16.msra.mxu3 %v769_v17 }
  0x4b   :  { %386 = vmatmul.bf16.gmra.mxu1 %v773_v38 }
  0x4e   :  { %852 = vmatpush.bf16.msra.mxu3 %v768_v19 }
  0x52   :  { %853 = vmatpush.bf16.msra.mxu3 %v767_v21 }
  0x55   :  { %190 = vmatmul.bf16.gmra.mxu0 %v750_v13  ;;  %411 = vmatmul.bf16.gmra.mxu3 %v778_v34 }
  0x56   :  { %854 = vmatpush.bf16.msra.mxu3 %v766_v24 }
  0x5a   :  { %855 = vmatpush.bf16.msra.mxu3 %v765_v29 }
  0x5b   :  { %391 = vmatmul.bf16.gmra.mxu1 %v774_v45 }
  0x5e   :  { %856 = vmatpush.bf16.msra.mxu3 %v764_v31 }
  0x62   :  { %857 = vmatpush.bf16.msra.mxu3 %v763_v32 }
  0x65   :  { %195 = vmatmul.bf16.gmra.mxu0 %v751_v22 }
  0x6b   :  { %396 = vmatmul.bf16.gmra.mxu1 %v775_v51 }
  0x75   :  { %200 = vmatmul.bf16.gmra.mxu0 %v752_v27 }
  0x7b   :  { %401 = vmatmul.bf16.gmra.mxu1 %v776_v55 }
  0xa2   :  { %v176_v36 = vpop.f32.mrf.mxu0 }
  0xa8   :  { %v206_v37 = vpop.f32.mrf.mxu3  ;;  %v377_v2 = vpop.f32.mrf.mxu1 }
  0xaa   :  { %v178_v39 = vpop.f32.mrf.mxu0 }
  0xab   :  { %v216_v40 = vpack.c.bf16 %v178_v39, %v176_v36 }
  0xad   :  { %473 = vmatmul.bf16.vlgmr.msra.gmra.mxu2 %v216_v40 }
  0xb0   :  { %v208_v41 = vpop.f32.mrf.mxu3  ;;  %v379_v4 = vpop.f32.mrf.mxu1 }
  0xb1   :  { %v222_v42 = vpack.c.bf16 %v208_v41, %v206_v37 }
  0xb2   :  { %v181_v43 = vpop.f32.mrf.mxu0 }
  0xb3   :  { %503 = vmatmul.bf16.vlgmr.msra.gmra.mxu3 %v222_v42 }
  0xb8   :  { %v211_v44 = vpop.f32.mrf.mxu3  ;;  %v382_v6 = vpop.f32.mrf.mxu1 }
  0xba   :  { %v183_v46 = vpop.f32.mrf.mxu0 }
  0xbb   :  { %v217_v47 = vpack.c.bf16 %v183_v46, %v181_v43 }
  0xbd   :  { %478 = vmatmul.bf16.gmra.mxu2 %v217_v47 }
  0xc0   :  { %v213_v48 = vpop.f32.mrf.mxu3  ;;  %v384_v12 = vpop.f32.mrf.mxu1 }
  0xc1   :  { %v223_v49 = vpack.c.bf16 %v213_v48, %v211_v44 }
  0xc2   :  { %v186_v50 = vpop.f32.mrf.mxu0 }
  0xc3   :  { %508 = vmatmul.bf16.gmra.mxu3 %v223_v49 }
  0xc8   :  { %v407_v0 = vpop.f32.mrf.mxu3  ;;  %v387_v26 = vpop.f32.mrf.mxu1 }
  0xca   :  { %v188_v52 = vpop.f32.mrf.mxu0 }
  0xcb   :  { %v218_v53 = vpack.c.bf16 %v188_v52, %v186_v50 }
  0xcd   :  { %483 = vmatmul.bf16.gmra.mxu2 %v218_v53 }
  0xd0   :  { %v409_v1 = vpop.f32.mrf.mxu3  ;;  %v389_v36 = vpop.f32.mrf.mxu1 }
  0xd2   :  { %v191_v54 = vpop.f32.mrf.mxu0 }
  0xd8   :  { %v412_v3 = vpop.f32.mrf.mxu3  ;;  %v392_v49 = vpop.f32.mrf.mxu1 }
  0xda   :  { %v193_v56 = vpop.f32.mrf.mxu0 }
  0xdb   :  { %v219_v57 = vpack.c.bf16 %v193_v56, %v191_v54 }
  0xdd   :  { %488 = vmatmul.bf16.gmra.mxu2 %v219_v57 }
  0xe0   :  { %v414_v5 = vpop.f32.mrf.mxu3  ;;  %v394_v57 = vpop.f32.mrf.mxu1 }
  0xe2   :  { %v196_v58 = vpop.f32.mrf.mxu0 }
  0xea   :  { %v198_v59 = vpop.f32.mrf.mxu0 }
  0xeb   :  { %v220_v60 = vpack.c.bf16 %v198_v59, %v196_v58 }
  0xed   :  { %493 = vmatmul.bf16.gmra.mxu2 %v220_v60 }
  0xf2   :  { %v201_v61 = vpop.f32.mrf.mxu0 }
  0xfa   :  { %v203_v62 = vpop.f32.mrf.mxu0 }
  0xfb   :  { %v221_v63 = vpack.c.bf16 %v203_v62, %v201_v61 }
  0xfd   :  { %498 = vmatmul.bf16.gmra.mxu2 %v221_v63  ;;  %v397_v63 = vpop.f32.mrf.mxu1 }
 0x130   :  { %v474_v7 = vpop.f32.mrf.mxu2 }
 0x131   :  { %v475_v8 = vadd.f32 %v474_v7, %v377_v2 }
 0x133   :  { %v518_v13 = vadd.f32 %v1028_v9, %v475_v8 }
 0x135   :  { %v534_v17 = vmax.f32 %v518_v13, 0.0 }
 0x136   :  { %v504_v10 = vpop.f32.mrf.mxu3 }
 0x137   :  { %v505_v15 = vadd.f32 %v504_v10, %v407_v0 }
 0x138   :  { %v476_v11 = vpop.f32.mrf.mxu2 }
 0x139   :  { %v477_v14 = vadd.f32 %v476_v11, %v379_v4  ;;  %v530_v19 = vadd.f32 %v1028_v9, %v505_v15 }
 0x13b   :  { %v519_v16 = vadd.f32 %v1028_v9, %v477_v14  ;;  %v546_v24 = vmax.f32 %v530_v19, 0.0 }
 0x13d   :  { %v535_v18 = vmax.f32 %v519_v16, 0.0 }
 0x13e   :  { %v506_v20 = vpop.f32.mrf.mxu3 }
 0x13f   :  { %v790_v21 = vpack.c.bf16 %v535_v18, %v534_v17  ;;  %v507_v22 = vadd.f32 %v506_v20, %v409_v1 }
 0x140   :  { %v479_v23 = vpop.f32.mrf.mxu2 }
 0x141   :  { %791 = vst [vmem:[%s1076_s6] sm:$0xff] %v790_v21   ;;  %v531_v25 = vadd.f32 %v1028_v9, %v507_v22  ;;  %v480_v28 = vadd.f32 %v479_v23, %v382_v6 }
 0x143   :  { %v547_v27 = vmax.f32 %v531_v25, 0.0  ;;  %v520_v32 = vadd.f32 %v1028_v9, %v480_v28 }
 0x145   :  { %v820_v29 = vpack.c.bf16 %v547_v27, %v546_v24  ;;  %v536_v37 = vmax.f32 %v520_v32, 0.0 }
 0x146   :  { %v509_v30 = vpop.f32.mrf.mxu3 }
 0x147   :  { %832 = vst [vmem:[%s1076_s6 + $0x30] sm:$0xff] %v820_v29   ;;  %v510_v34 = vadd.f32 %v509_v30, %v412_v3 }
 0x148   :  { %v481_v31 = vpop.f32.mrf.mxu2 }
 0x149   :  { %v482_v33 = vadd.f32 %v481_v31, %v384_v12  ;;  %v532_v39 = vadd.f32 %v1028_v9, %v510_v34 }
 0x14b   :  { %v521_v35 = vadd.f32 %v1028_v9, %v482_v33  ;;  %v548_v44 = vmax.f32 %v532_v39, 0.0 }
 0x14d   :  { %v537_v38 = vmax.f32 %v521_v35, 0.0 }
 0x14e   :  { %v511_v40 = vpop.f32.mrf.mxu3 }
 0x14f   :  { %v795_v41 = vpack.c.bf16 %v537_v38, %v536_v37  ;;  %v512_v42 = vadd.f32 %v511_v40, %v414_v5  ;;  %v399_v5 = vpop.f32.mrf.mxu1 }
 0x150   :  { %v484_v43 = vpop.f32.mrf.mxu2 }
 0x151   :  { %827 = vst [vmem:[%s1076_s6 + $0x8] sm:$0xff] %v795_v41   ;;  %v533_v45 = vadd.f32 %v1028_v9, %v512_v42  ;;  %v485_v47 = vadd.f32 %v484_v43, %v387_v26 }
 0x153   :  { %v549_v46 = vmax.f32 %v533_v45, 0.0  ;;  %v522_v51 = vadd.f32 %v1028_v9, %v485_v47 }
 0x155   :  { %v825_v48 = vpack.c.bf16 %v549_v46, %v548_v44  ;;  %v538_v54 = vmax.f32 %v522_v51, 0.0 }
 0x157   :  { %833 = vst [vmem:[%s1076_s6 + $0x38] sm:$0xff] %v825_v48   ;;  %v402_v14 = vpop.f32.mrf.mxu1 }
 0x158   :  { %v486_v50 = vpop.f32.mrf.mxu2 }
 0x159   :  { %v487_v52 = vadd.f32 %v486_v50, %v389_v36 }
 0x15b   :  { %v523_v53 = vadd.f32 %v1028_v9, %v487_v52 }
 0x15d   :  { %v539_v55 = vmax.f32 %v523_v53, 0.0 }
 0x15f   :  { %v800_v56 = vpack.c.bf16 %v539_v55, %v538_v54  ;;  %v404_v18 = vpop.f32.mrf.mxu1 }
 0x160   :  { %v489_v58 = vpop.f32.mrf.mxu2 }
 0x161   :  { %828 = vst [vmem:[%s1076_s6 + $0x10] sm:$0xff] %v800_v56   ;;  %v490_v59 = vadd.f32 %v489_v58, %v392_v49 }
 0x163   :  { %v524_v61 = vadd.f32 %v1028_v9, %v490_v59 }
 0x165   :  { %v540_v1 = vmax.f32 %v524_v61, 0.0 }
 0x168   :  { %v491_v60 = vpop.f32.mrf.mxu2 }
 0x169   :  { %v492_v62 = vadd.f32 %v491_v60, %v394_v57 }
 0x16b   :  { %v525_v0 = vadd.f32 %v1028_v9, %v492_v62 }
 0x16d   :  { %v541_v2 = vmax.f32 %v525_v0, 0.0 }
 0x16f   :  { %v805_v3 = vpack.c.bf16 %v541_v2, %v540_v1 }
 0x170   :  { %v494_v4 = vpop.f32.mrf.mxu2 }
 0x171   :  { %829 = vst [vmem:[%s1076_s6 + $0x18] sm:$0xff] %v805_v3   ;;  %v495_v6 = vadd.f32 %v494_v4, %v397_v63 }
 0x173   :  { %v526_v8 = vadd.f32 %v1028_v9, %v495_v6 }
 0x175   :  { %v542_v12 = vmax.f32 %v526_v8, 0.0 }
 0x178   :  { %v496_v7 = vpop.f32.mrf.mxu2 }
 0x179   :  { %v497_v10 = vadd.f32 %v496_v7, %v399_v5 }
 0x17b   :  { %v527_v11 = vadd.f32 %v1028_v9, %v497_v10 }
 0x17d   :  { %v543_v13 = vmax.f32 %v527_v11, 0.0 }
 0x17f   :  { %v810_v15 = vpack.c.bf16 %v543_v13, %v542_v12 }
 0x180   :  { %v499_v16 = vpop.f32.mrf.mxu2 }
 0x181   :  { %830 = vst [vmem:[%s1076_s6 + $0x20] sm:$0xff] %v810_v15   ;;  %v500_v17 = vadd.f32 %v499_v16, %v402_v14 }
 0x183   :  { %v528_v20 = vadd.f32 %v1028_v9, %v500_v17 }
 0x185   :  { %v544_v23 = vmax.f32 %v528_v20, 0.0 }
 0x188   :  { %v501_v19 = vpop.f32.mrf.mxu2 }
 0x189   :  { %v502_v21 = vadd.f32 %v501_v19, %v404_v18 }
 0x18b   :  { %v529_v22 = vadd.f32 %v1028_v9, %v502_v21 }
 0x18d   :  { %v545_v24 = vmax.f32 %v529_v22, 0.0 }
 0x18f   :  { %v815_v25 = vpack.c.bf16 %v545_v24, %v544_v23 }
 0x191   :  { %831 = vst [vmem:[%s1076_s6 + $0x28] sm:$0xff] %v815_v25  }
 0x192   :  { %586 = vsyncpa [#allocation3], 1 }

// kernel: model_forward.8
= control target key start
LH: loop header
LB: loop body
LE: loop exit
PB: predicated region body
PF: predicated region fallthrough
CT: control target
= control target key end

     0   :  { %s1026_s1 = inlined_call_operand.vmem [shape: bf16[128,128], index: 1, kind: input, shape index: {}]   ;;  %s1027_s0 = inlined_call_operand.vmem [shape: bf16[128,128], index: 0, kind: input, shape index: {}]   ;;  %s1028_s5 = inlined_call_operand.vmem [shape: bf16[128,128], index: 5, kind: input, shape index: {}]   ;;  %s1029_s3 = inlined_call_operand.vmem [shape: bf16[128,128], index: 3, kind: input, shape index: {}]   ;;  %s1030_s2 = inlined_call_operand.vmem [shape: bf16[128,128], index: 2, kind: input, shape index: {}]   ;;  %s1031_s4 = inlined_call_operand.vmem [shape: f32[1,128], index: 4, kind: input, shape index: {}]   ;;  %s1032_s6 = inlined_call_operand.vmem [shape: bf16[128,128], index: 6, kind: output, shape index: {}]  }
   0x1   :  { %v729_v0 = vld [vmem:[%s1026_s1 + $0x38] sm:$0xff]  ;;  %v728_v1 = vld [vmem:[%s1026_s1 + $0x30] sm:$0xff]  ;;  %v727_v2 = vld [vmem:[%s1026_s1 + $0x28] sm:$0xff] }
   0x2   :  { %151 = vmatpush.bf16.msra.mxu0 %v729_v0  ;;  %801 = vmatpush.bf16.msra.mxu3 %v729_v0  ;;  %v726_v3 = vld [vmem:[%s1026_s1 + $0x20] sm:$0xff]  ;;  %v725_v4 = vld [vmem:[%s1026_s1 + $0x18] sm:$0xff]  ;;  %v724_v5 = vld [vmem:[%s1026_s1 + $0x10] sm:$0xff] }
   0x3   :  { %v723_v6 = vld [vmem:[%s1026_s1 + $0x8] sm:$0xff]  ;;  %v722_v7 = vld [vmem:[%s1026_s1] sm:$0xff]  ;;  %v720_v9 = vld [vmem:[%s1027_s0 + $0x30] sm:$0xff] }
   0x4   :  { %v714_v8 = vld [vmem:[%s1027_s0] sm:$0xff]  ;;  %v715_v10 = vld [vmem:[%s1027_s0 + $0x8] sm:$0xff]  ;;  %v721_v11 = vld [vmem:[%s1027_s0 + $0x38] sm:$0xff] }
   0x5   :  { %v716_v12 = vld [vmem:[%s1027_s0 + $0x10] sm:$0xff]  ;;  %v717_v13 = vld [vmem:[%s1027_s0 + $0x18] sm:$0xff]  ;;  %v751_v18 = vld [vmem:[%s1028_s5 + $0x28] sm:$0xff] }
   0x6   :  { %152 = vmatpush.bf16.msra.mxu0 %v728_v1  ;;  %802 = vmatpush.bf16.msra.mxu3 %v728_v1  ;;  %v753_v14 = vld [vmem:[%s1028_s5 + $0x38] sm:$0xff]  ;;  %v752_v16 = vld [vmem:[%s1028_s5 + $0x30] sm:$0xff]  ;;  %v735_v19 = vld [vmem:[%s1029_s3 + $0x28] sm:$0xff] }
   0x7   :  { %v737_v15 = vld [vmem:[%s1029_s3 + $0x38] sm:$0xff]  ;;  %352 = vmatpush.bf16.msra.mxu1 %v753_v14  ;;  %v736_v17 = vld [vmem:[%s1029_s3 + $0x30] sm:$0xff]  ;;  %v750_v20 = vld [vmem:[%s1028_s5 + $0x20] sm:$0xff] }
   0x8   :  { %449 = vmatpush.bf16.msra.mxu2 %v737_v15  ;;  %v734_v21 = vld [vmem:[%s1029_s3 + $0x20] sm:$0xff]  ;;  %v749_v23 = vld [vmem:[%s1028_s5 + $0x18] sm:$0xff]  ;;  %v748_v25 = vld [vmem:[%s1028_s5 + $0x10] sm:$0xff] }
   0x9   :  { %v718_v22 = vld [vmem:[%s1027_s0 + $0x20] sm:$0xff]  ;;  %v733_v24 = vld [vmem:[%s1029_s3 + $0x18] sm:$0xff]  ;;  %v747_v26 = vld [vmem:[%s1028_s5 + $0x8] sm:$0xff] }
   0xa   :  { %153 = vmatpush.bf16.msra.mxu0 %v727_v2  ;;  %803 = vmatpush.bf16.msra.mxu3 %v727_v2  ;;  %v719_v27 = vld [vmem:[%s1027_s0 + $0x28] sm:$0xff]  ;;  %v746_v28 = vld [vmem:[%s1028_s5] sm:$0xff]  ;;  %v732_v29 = vld [vmem:[%s1029_s3 + $0x10] sm:$0xff] }
   0xb   :  { %353 = vmatpush.bf16.msra.mxu1 %v752_v16  ;;  %v744_v30 = vld [vmem:[%s1030_s2 + $0x30] sm:$0xff]  ;;  %v731_v31 = vld [vmem:[%s1029_s3 + $0x8] sm:$0xff]  ;;  %v730_v32 = vld [vmem:[%s1029_s3] sm:$0xff] }
   0xc   :  { %450 = vmatpush.bf16.msra.mxu2 %v736_v17  ;;  %v738_v33 = vld [vmem:[%s1030_s2] sm:$0xff]  ;;  %v745_v34 = vld [vmem:[%s1030_s2 + $0x38] sm:$0xff]  ;;  %v739_v35 = vld [vmem:[%s1030_s2 + $0x8] sm:$0xff] }
   0xd   :  { %v740_v38 = vld [vmem:[%s1030_s2 + $0x10] sm:$0xff]  ;;  %v741_v45 = vld [vmem:[%s1030_s2 + $0x18] sm:$0xff]  ;;  %v742_v51 = vld [vmem:[%s1030_s2 + $0x20] sm:$0xff] }
   0xe   :  { %154 = vmatpush.bf16.msra.mxu0 %v726_v3  ;;  %804 = vmatpush.bf16.msra.mxu3 %v726_v3  ;;  %v743_v55 = vld [vmem:[%s1030_s2 + $0x28] sm:$0xff] }
   0xf   :  { %354 = vmatpush.bf16.msra.mxu1 %v751_v18 }
  0x10   :  { %451 = vmatpush.bf16.msra.mxu2 %v735_v19 }
  0x12   :  { %155 = vmatpush.bf16.msra.mxu0 %v725_v4  ;;  %805 = vmatpush.bf16.msra.mxu3 %v725_v4 }
  0x13   :  { %355 = vmatpush.bf16.msra.mxu1 %v750_v20 }
  0x14   :  { %452 = vmatpush.bf16.msra.mxu2 %v734_v21 }
  0x16   :  { %156 = vmatpush.bf16.msra.mxu0 %v724_v5  ;;  %806 = vmatpush.bf16.msra.mxu3 %v724_v5 }
  0x17   :  { %356 = vmatpush.bf16.msra.mxu1 %v749_v23 }
  0x18   :  { %453 = vmatpush.bf16.msra.mxu2 %v733_v24 }
  0x1a   :  { %157 = vmatpush.bf16.msra.mxu0 %v723_v6  ;;  %807 = vmatpush.bf16.msra.mxu3 %v723_v6 }
  0x1b   :  { %357 = vmatpush.bf16.msra.mxu1 %v748_v25 }
  0x1c   :  { %454 = vmatpush.bf16.msra.mxu2 %v732_v29 }
  0x1e   :  { %158 = vmatpush.bf16.msra.mxu0 %v722_v7  ;;  %808 = vmatpush.bf16.msra.mxu3 %v722_v7 }
  0x1f   :  { %358 = vmatpush.bf16.msra.mxu1 %v747_v26 }
  0x20   :  { %455 = vmatpush.bf16.msra.mxu2 %v731_v31 }
  0x21   :  { %159 = vmatmul.bf16.vlgmr.msra.gmra.mxu0 %v714_v8  ;;  %189 = vmatmul.bf16.vlgmr.msra.gmra.mxu3 %v720_v9 }
  0x22   :  { %809 = vmatpush.bf16.msrb.mxu3 %v753_v14 }
  0x23   :  { %359 = vmatpush.bf16.msra.mxu1 %v746_v28 }
  0x24   :  { %456 = vmatpush.bf16.msra.mxu2 %v730_v32 }
  0x26   :  { %810 = vmatpush.bf16.msrb.mxu3 %v752_v16  ;;  %360 = vmatmul.bf16.vlgmr.msra.gmra.mxu1 %v738_v33 }
  0x2a   :  { %811 = vmatpush.bf16.msrb.mxu3 %v751_v18 }
  0x2e   :  { %812 = vmatpush.bf16.msrb.mxu3 %v750_v20 }
  0x31   :  { %164 = vmatmul.bf16.gmra.mxu0 %v715_v10  ;;  %194 = vmatmul.bf16.gmra.mxu3 %v721_v11  ;;  %v984_v10 = vld [vmem:[%s1031_s4] ss:$0 sm:$0xff] }
  0x32   :  { %813 = vmatpush.bf16.msrb.mxu3 %v749_v23 }
  0x36   :  { %814 = vmatpush.bf16.msrb.mxu3 %v748_v25  ;;  %365 = vmatmul.bf16.gmra.mxu1 %v739_v35 }
  0x3a   :  { %815 = vmatpush.bf16.msrb.mxu3 %v747_v26 }
  0x3e   :  { %816 = vmatpush.bf16.msrb.mxu3 %v746_v28 }
  0x41   :  { %169 = vmatmul.bf16.gmra.mxu0 %v716_v12  ;;  %390 = vmatmul.bf16.vlgmr.msrb.gmra.mxu3 %v744_v30 }
  0x42   :  { %817 = vmatpush.bf16.msra.mxu3 %v737_v15 }
  0x46   :  { %818 = vmatpush.bf16.msra.mxu3 %v736_v17  ;;  %370 = vmatmul.bf16.gmra.mxu1 %v740_v38 }
  0x4a   :  { %819 = vmatpush.bf16.msra.mxu3 %v735_v19 }
  0x4e   :  { %820 = vmatpush.bf16.msra.mxu3 %v734_v21 }
  0x51   :  { %174 = vmatmul.bf16.gmra.mxu0 %v717_v13  ;;  %395 = vmatmul.bf16.gmra.mxu3 %v745_v34 }
  0x52   :  { %821 = vmatpush.bf16.msra.mxu3 %v733_v24 }
  0x56   :  { %822 = vmatpush.bf16.msra.mxu3 %v732_v29  ;;  %375 = vmatmul.bf16.gmra.mxu1 %v741_v45 }
  0x5a   :  { %823 = vmatpush.bf16.msra.mxu3 %v731_v31 }
  0x5e   :  { %824 = vmatpush.bf16.msra.mxu3 %v730_v32 }
  0x61   :  { %179 = vmatmul.bf16.gmra.mxu0 %v718_v22 }
  0x66   :  { %380 = vmatmul.bf16.gmra.mxu1 %v742_v51 }
  0x71   :  { %184 = vmatmul.bf16.gmra.mxu0 %v719_v27 }
  0x76   :  { %385 = vmatmul.bf16.gmra.mxu1 %v743_v55 }
  0x9e   :  { %v160_v36 = vpop.f32.mrf.mxu0 }
  0xa3   :  { %v361_v2 = vpop.f32.mrf.mxu1 }
  0xa4   :  { %v190_v37 = vpop.f32.mrf.mxu3 }
  0xa6   :  { %v162_v39 = vpop.f32.mrf.mxu0 }
  0xa7   :  { %v200_v40 = vpack.c.bf16 %v162_v39, %v160_v36 }
  0xa9   :  { %457 = vmatmul.bf16.vlgmr.msra.gmra.mxu2 %v200_v40 }
  0xab   :  { %v363_v4 = vpop.f32.mrf.mxu1 }
  0xac   :  { %v192_v41 = vpop.f32.mrf.mxu3 }
  0xad   :  { %v206_v42 = vpack.c.bf16 %v192_v41, %v190_v37 }
  0xae   :  { %v165_v43 = vpop.f32.mrf.mxu0 }
  0xaf   :  { %487 = vmatmul.bf16.vlgmr.msra.gmra.mxu3 %v206_v42 }
  0xb3   :  { %v366_v6 = vpop.f32.mrf.mxu1 }
  0xb4   :  { %v195_v44 = vpop.f32.mrf.mxu3 }
  0xb6   :  { %v167_v46 = vpop.f32.mrf.mxu0 }
  0xb7   :  { %v201_v47 = vpack.c.bf16 %v167_v46, %v165_v43 }
  0xb9   :  { %462 = vmatmul.bf16.gmra.mxu2 %v201_v47 }
  0xbb   :  { %v368_v12 = vpop.f32.mrf.mxu1 }
  0xbc   :  { %v197_v48 = vpop.f32.mrf.mxu3 }
  0xbd   :  { %v207_v49 = vpack.c.bf16 %v197_v48, %v195_v44 }
  0xbe   :  { %v170_v50 = vpop.f32.mrf.mxu0 }
  0xbf   :  { %492 = vmatmul.bf16.gmra.mxu3 %v207_v49 }
  0xc3   :  { %v371_v23 = vpop.f32.mrf.mxu1 }
  0xc4   :  { %v391_v0 = vpop.f32.mrf.mxu3 }
  0xc6   :  { %v172_v52 = vpop.f32.mrf.mxu0 }
  0xc7   :  { %v202_v53 = vpack.c.bf16 %v172_v52, %v170_v50 }
  0xc9   :  { %467 = vmatmul.bf16.gmra.mxu2 %v202_v53 }
  0xcb   :  { %v373_v32 = vpop.f32.mrf.mxu1 }
  0xcc   :  { %v393_v1 = vpop.f32.mrf.mxu3 }
  0xce   :  { %v175_v54 = vpop.f32.mrf.mxu0 }
  0xd3   :  { %v376_v40 = vpop.f32.mrf.mxu1 }
  0xd4   :  { %v396_v3 = vpop.f32.mrf.mxu3 }
  0xd6   :  { %v177_v56 = vpop.f32.mrf.mxu0 }
  0xd7   :  { %v203_v57 = vpack.c.bf16 %v177_v56, %v175_v54 }
  0xd9   :  { %472 = vmatmul.bf16.gmra.mxu2 %v203_v57 }
  0xdb   :  { %v378_v47 = vpop.f32.mrf.mxu1 }
  0xdc   :  { %v398_v5 = vpop.f32.mrf.mxu3 }
  0xde   :  { %v180_v58 = vpop.f32.mrf.mxu0 }
  0xe3   :  { %v381_v52 = vpop.f32.mrf.mxu1 }
  0xe6   :  { %v182_v59 = vpop.f32.mrf.mxu0 }
  0xe7   :  { %v204_v60 = vpack.c.bf16 %v182_v59, %v180_v58 }
  0xe9   :  { %477 = vmatmul.bf16.gmra.mxu2 %v204_v60 }
  0xeb   :  { %v383_v57 = vpop.f32.mrf.mxu1 }
  0xee   :  { %v185_v61 = vpop.f32.mrf.mxu0 }
  0xf6   :  { %v187_v62 = vpop.f32.mrf.mxu0 }
  0xf7   :  { %v205_v63 = vpack.c.bf16 %v187_v62, %v185_v61 }
  0xf9   :  { %482 = vmatmul.bf16.gmra.mxu2 %v205_v63 }
 0x12c   :  { %v458_v7 = vpop.f32.mrf.mxu2 }
 0x12d   :  { %v459_v9 = vadd.f32 %v458_v7, %v361_v2 }
 0x12f   :  { %v502_v14 = vadd.f32 %v984_v10, %v459_v9 }
 0x132   :  { %v488_v8 = vpop.f32.mrf.mxu3 }
 0x133   :  { %v489_v16 = vadd.f32 %v488_v8, %v391_v0  ;;  %v386_v0 = vpop.f32.mrf.mxu1 }
 0x134   :  { %v460_v11 = vpop.f32.mrf.mxu2 }
 0x135   :  { %v461_v13 = vadd.f32 %v460_v11, %v363_v4  ;;  %v514_v19 = vadd.f32 %v984_v10, %v489_v16 }
 0x137   :  { %v503_v15 = vadd.f32 %v984_v10, %v461_v13 }
 0x139   :  { %v757_v17 = vpack.c.bf16 %v503_v15, %v502_v14 }
 0x13a   :  { %v490_v18 = vpop.f32.mrf.mxu3 }
 0x13b   :  { %758 = vst [vmem:[%s1032_s6] sm:$0xff] %v757_v17   ;;  %v491_v20 = vadd.f32 %v490_v18, %v393_v1 }
 0x13c   :  { %v463_v21 = vpop.f32.mrf.mxu2 }
 0x13d   :  { %v515_v22 = vadd.f32 %v984_v10, %v491_v20  ;;  %v464_v26 = vadd.f32 %v463_v21, %v366_v6 }
 0x13f   :  { %v787_v24 = vpack.c.bf16 %v515_v22, %v514_v19  ;;  %v504_v29 = vadd.f32 %v984_v10, %v464_v26 }
 0x141   :  { %799 = vst [vmem:[%s1032_s6 + $0x30] sm:$0xff] %v787_v24  }
 0x142   :  { %v493_v25 = vpop.f32.mrf.mxu3 }
 0x143   :  { %v494_v31 = vadd.f32 %v493_v25, %v396_v3  ;;  %v388_v3 = vpop.f32.mrf.mxu1 }
 0x144   :  { %v465_v27 = vpop.f32.mrf.mxu2 }
 0x145   :  { %v466_v28 = vadd.f32 %v465_v27, %v368_v12  ;;  %v516_v35 = vadd.f32 %v984_v10, %v494_v31 }
 0x147   :  { %v505_v30 = vadd.f32 %v984_v10, %v466_v28 }
 0x149   :  { %v762_v33 = vpack.c.bf16 %v505_v30, %v504_v29 }
 0x14a   :  { %v495_v34 = vpop.f32.mrf.mxu3 }
 0x14b   :  { %794 = vst [vmem:[%s1032_s6 + $0x8] sm:$0xff] %v762_v33   ;;  %v496_v36 = vadd.f32 %v495_v34, %v398_v5 }
 0x14c   :  { %v468_v37 = vpop.f32.mrf.mxu2 }
 0x14d   :  { %v517_v38 = vadd.f32 %v984_v10, %v496_v36  ;;  %v469_v41 = vadd.f32 %v468_v37, %v371_v23 }
 0x14f   :  { %v792_v39 = vpack.c.bf16 %v517_v38, %v516_v35  ;;  %v506_v44 = vadd.f32 %v984_v10, %v469_v41 }
 0x151   :  { %800 = vst [vmem:[%s1032_s6 + $0x38] sm:$0xff] %v792_v39  }
 0x154   :  { %v470_v42 = vpop.f32.mrf.mxu2 }
 0x155   :  { %v471_v43 = vadd.f32 %v470_v42, %v373_v32 }
 0x157   :  { %v507_v45 = vadd.f32 %v984_v10, %v471_v43 }
 0x159   :  { %v767_v46 = vpack.c.bf16 %v507_v45, %v506_v44 }
 0x15b   :  { %795 = vst [vmem:[%s1032_s6 + $0x10] sm:$0xff] %v767_v46  }
 0x15c   :  { %v473_v48 = vpop.f32.mrf.mxu2 }
 0x15d   :  { %v474_v49 = vadd.f32 %v473_v48, %v376_v40 }
 0x15f   :  { %v508_v53 = vadd.f32 %v984_v10, %v474_v49 }
 0x164   :  { %v475_v50 = vpop.f32.mrf.mxu2 }
 0x165   :  { %v476_v51 = vadd.f32 %v475_v50, %v378_v47 }
 0x167   :  { %v509_v54 = vadd.f32 %v984_v10, %v476_v51 }
 0x169   :  { %v772_v55 = vpack.c.bf16 %v509_v54, %v508_v53 }
 0x16b   :  { %796 = vst [vmem:[%s1032_s6 + $0x18] sm:$0xff] %v772_v55  }
 0x16c   :  { %v478_v56 = vpop.f32.mrf.mxu2 }
 0x16d   :  { %v479_v58 = vadd.f32 %v478_v56, %v381_v52 }
 0x16f   :  { %v510_v61 = vadd.f32 %v984_v10, %v479_v58 }
 0x174   :  { %v480_v59 = vpop.f32.mrf.mxu2 }
 0x175   :  { %v481_v60 = vadd.f32 %v480_v59, %v383_v57 }
 0x177   :  { %v511_v62 = vadd.f32 %v984_v10, %v481_v60 }
 0x179   :  { %v777_v63 = vpack.c.bf16 %v511_v62, %v510_v61 }
 0x17b   :  { %797 = vst [vmem:[%s1032_s6 + $0x20] sm:$0xff] %v777_v63  }
 0x17c   :  { %v483_v1 = vpop.f32.mrf.mxu2 }
 0x17d   :  { %v484_v2 = vadd.f32 %v483_v1, %v386_v0 }
 0x17f   :  { %v512_v6 = vadd.f32 %v984_v10, %v484_v2 }
 0x184   :  { %v485_v4 = vpop.f32.mrf.mxu2 }
 0x185   :  { %v486_v5 = vadd.f32 %v485_v4, %v388_v3 }
 0x187   :  { %v513_v7 = vadd.f32 %v984_v10, %v486_v5 }
 0x189   :  { %v782_v8 = vpack.c.bf16 %v513_v7, %v512_v6 }
 0x18b   :  { %798 = vst [vmem:[%s1032_s6 + $0x28] sm:$0xff] %v782_v8  }

// kernel: model_forward.9
= control target key start
LH: loop header
LB: loop body
LE: loop exit
PB: predicated region body
PF: predicated region fallthrough
CT: control target
= control target key end

     0   :  { %s787_s3 = inlined_call_operand.vmem [shape: bf16[128,128], index: 3, kind: input, shape index: {}]   ;;  %s788_s2 = inlined_call_operand.vmem [shape: bf16[128,128], index: 2, kind: input, shape index: {}]   ;;  %s789_s1 = inlined_call_operand.vmem [shape: bf16[128,128], index: 1, kind: input, shape index: {}]   ;;  %s790_s0 = inlined_call_operand.vmem [shape: bf16[128,128], index: 0, kind: input, shape index: {}]   ;;  %s791_s4 = inlined_call_operand.vmem [shape: f32[1,128], index: 4, kind: input, shape index: {}]   ;;  %s792_s5 = inlined_call_operand.vmem [shape: bf16[8,128], index: 5, kind: input, shape index: {}]   ;;  %s793_s6 = inlined_call_operand.<no memory space> [shape: f32[1,1], index: 6, kind: input, shape index: {}]   ;;  %s794_s7 = inlined_call_operand.vmem [shape: f32[8,128], index: 7, kind: output, shape index: {}]  }
   0x1   :  { %v605_v0 = vld [vmem:[%s787_s3 + $0x38] sm:$0xff]  ;;  %v604_v2 = vld [vmem:[%s787_s3 + $0x30] sm:$0xff]  ;;  %v603_v4 = vld [vmem:[%s787_s3 + $0x28] sm:$0xff] }
   0x2   :  { %v589_v1 = vld [vmem:[%s788_s2 + $0x38] sm:$0xff]  ;;  %187 = vmatpush.bf16.msra.mxu0 %v605_v0  ;;  %v588_v3 = vld [vmem:[%s788_s2 + $0x30] sm:$0xff]  ;;  %606 = vmatpush.bf16.msra.mxu3 %v605_v0  ;;  %v587_v5 = vld [vmem:[%s788_s2 + $0x28] sm:$0xff] }
   0x3   :  { %332 = vmatpush.bf16.msra.mxu1 %v589_v1  ;;  %v602_v6 = vld [vmem:[%s787_s3 + $0x20] sm:$0xff]  ;;  %v601_v8 = vld [vmem:[%s787_s3 + $0x18] sm:$0xff]  ;;  %v600_v10 = vld [vmem:[%s787_s3 + $0x10] sm:$0xff] }
   0x4   :  { %v586_v7 = vld [vmem:[%s788_s2 + $0x20] sm:$0xff]  ;;  %v585_v9 = vld [vmem:[%s788_s2 + $0x18] sm:$0xff]  ;;  %v584_v11 = vld [vmem:[%s788_s2 + $0x10] sm:$0xff] }
   0x5   :  { %v599_v12 = vld [vmem:[%s787_s3 + $0x8] sm:$0xff]  ;;  %v598_v14 = vld [vmem:[%s787_s3] sm:$0xff]  ;;  %v592_v20 = vld [vmem:[%s789_s1 + $0x10] sm:$0xff] }
   0x6   :  { %188 = vmatpush.bf16.msra.mxu0 %v604_v2  ;;  %607 = vmatpush.bf16.msra.mxu3 %v604_v2  ;;  %v583_v13 = vld [vmem:[%s788_s2 + $0x8] sm:$0xff]  ;;  %v582_v15 = vld [vmem:[%s788_s2] sm:$0xff]  ;;  %v576_v21 = vld [vmem:[%s790_s0 + $0x10] sm:$0xff] }
   0x7   :  { %333 = vmatpush.bf16.msra.mxu1 %v588_v3  ;;  %v590_v16 = vld [vmem:[%s789_s1] sm:$0xff]  ;;  %v591_v18 = vld [vmem:[%s789_s1 + $0x8] sm:$0xff]  ;;  %v593_v23 = vld [vmem:[%s789_s1 + $0x18] sm:$0xff] }
   0x8   :  { %v574_v17 = vld [vmem:[%s790_s0] sm:$0xff]  ;;  %v575_v19 = vld [vmem:[%s790_s0 + $0x8] sm:$0xff]  ;;  %v577_v24 = vld [vmem:[%s790_s0 + $0x18] sm:$0xff] }
   0x9   :  { %v595_v22 = vld [vmem:[%s789_s1 + $0x28] sm:$0xff]  ;;  %v596_v25 = vld [vmem:[%s789_s1 + $0x30] sm:$0xff]  ;;  %v594_v26 = vld [vmem:[%s789_s1 + $0x20] sm:$0xff] }
   0xa   :  { %189 = vmatpush.bf16.msra.mxu0 %v603_v4  ;;  %608 = vmatpush.bf16.msra.mxu3 %v603_v4  ;;  %v578_v27 = vld [vmem:[%s790_s0 + $0x20] sm:$0xff]  ;;  %v597_v28 = vld [vmem:[%s789_s1 + $0x38] sm:$0xff]  ;;  %v579_v29 = vld [vmem:[%s790_s0 + $0x28] sm:$0xff] }
   0xb   :  { %334 = vmatpush.bf16.msra.mxu1 %v587_v5  ;;  %v580_v30 = vld [vmem:[%s790_s0 + $0x30] sm:$0xff]  ;;  %v581_v31 = vld [vmem:[%s790_s0 + $0x38] sm:$0xff]  ;;  %v754_v35 = vld [vmem:[%s791_s4] ss:$0 sm:$0xff] }
   0xe   :  { %190 = vmatpush.bf16.msra.mxu0 %v602_v6  ;;  %609 = vmatpush.bf16.msra.mxu3 %v602_v6 }
   0xf   :  { %335 = vmatpush.bf16.msra.mxu1 %v586_v7 }
  0x12   :  { %191 = vmatpush.bf16.msra.mxu0 %v601_v8  ;;  %610 = vmatpush.bf16.msra.mxu3 %v601_v8 }
  0x13   :  { %336 = vmatpush.bf16.msra.mxu1 %v585_v9 }
  0x16   :  { %192 = vmatpush.bf16.msra.mxu0 %v600_v10  ;;  %611 = vmatpush.bf16.msra.mxu3 %v600_v10 }
  0x17   :  { %337 = vmatpush.bf16.msra.mxu1 %v584_v11 }
  0x1a   :  { %193 = vmatpush.bf16.msra.mxu0 %v599_v12  ;;  %612 = vmatpush.bf16.msra.mxu3 %v599_v12 }
  0x1b   :  { %338 = vmatpush.bf16.msra.mxu1 %v583_v13 }
  0x1e   :  { %194 = vmatpush.bf16.msra.mxu0 %v598_v14  ;;  %613 = vmatpush.bf16.msra.mxu3 %v598_v14 }
  0x1f   :  { %339 = vmatpush.bf16.msra.mxu1 %v582_v15 }
  0x21   :  { %195 = vmatmul.bf16.vlgmr.msra.gmra.mxu0 %v590_v16  ;;  %220 = vmatmul.bf16.vlgmr.msra.gmra.mxu3 %v595_v22 }
  0x22   :  { %340 = vmatmul.bf16.vlgmr.msra.gmra.mxu1 %v574_v17 }
  0x31   :  { %200 = vmatmul.bf16.gmra.mxu0 %v591_v18  ;;  %225 = vmatmul.bf16.gmra.mxu3 %v596_v25 }
  0x32   :  { %345 = vmatmul.bf16.gmra.mxu1 %v575_v19 }
  0x41   :  { %205 = vmatmul.bf16.gmra.mxu0 %v592_v20  ;;  %230 = vmatmul.bf16.gmra.mxu3 %v597_v28 }
  0x42   :  { %350 = vmatmul.bf16.gmra.mxu1 %v576_v21 }
  0x51   :  { %210 = vmatmul.bf16.gmra.mxu0 %v593_v23 }
  0x52   :  { %355 = vmatmul.bf16.gmra.mxu1 %v577_v24 }
  0x61   :  { %215 = vmatmul.bf16.gmra.mxu0 %v594_v26 }
  0x62   :  { %360 = vmatmul.bf16.gmra.mxu1 %v578_v27 }
  0x72   :  { %365 = vmatmul.bf16.gmra.mxu1 %v579_v29 }
  0x82   :  { %370 = vmatmul.bf16.gmra.mxu1 %v580_v30 }
  0x92   :  { %375 = vmatmul.bf16.gmra.mxu1 %v581_v31 }
  0x9e   :  { %v196_v32 = vpop.f32.mrf.mxu0 }
  0x9f   :  { %v341_v33 = vpop.f32.mrf.mxu1 }
  0xa0   :  { %v342_v34 = vadd.f32 %v341_v33, %v196_v32 }
  0xa2   :  { %v385_v38 = vadd.f32 %v754_v35, %v342_v34 }
  0xa4   :  { %v401_v41 = vmax.f32 %v385_v38, 0.0  ;;  %v221_v16 = vpop.f32.mrf.mxu3 }
  0xa6   :  { %v198_v36 = vpop.f32.mrf.mxu0 }
  0xa7   :  { %v343_v37 = vpop.f32.mrf.mxu1 }
  0xa8   :  { %v344_v39 = vadd.f32 %v343_v37, %v198_v36 }
  0xaa   :  { %v386_v40 = vadd.f32 %v754_v35, %v344_v39 }
  0xac   :  { %v402_v42 = vmax.f32 %v386_v40, 0.0  ;;  %v223_v25 = vpop.f32.mrf.mxu3 }
  0xae   :  { %v758_v43 = vpack.c.bf16 %v402_v42, %v401_v41  ;;  %v201_v44 = vpop.f32.mrf.mxu0 }
  0xaf   :  { %v346_v45 = vpop.f32.mrf.mxu1 }
  0xb0   :  { %v347_v46 = vadd.f32 %v346_v45, %v201_v44 }
  0xb2   :  { %v387_v49 = vadd.f32 %v754_v35, %v347_v46 }
  0xb4   :  { %v403_v52 = vmax.f32 %v387_v49, 0.0  ;;  %v226_v28 = vpop.f32.mrf.mxu3 }
  0xb6   :  { %v203_v47 = vpop.f32.mrf.mxu0 }
  0xb7   :  { %v348_v48 = vpop.f32.mrf.mxu1 }
  0xb8   :  { %v349_v50 = vadd.f32 %v348_v48, %v203_v47 }
  0xba   :  { %v388_v51 = vadd.f32 %v754_v35, %v349_v50 }
  0xbc   :  { %v404_v53 = vmax.f32 %v388_v51, 0.0  ;;  %v228_v30 = vpop.f32.mrf.mxu3 }
  0xbe   :  { %v762_v54 = vpack.c.bf16 %v404_v53, %v403_v52  ;;  %v206_v55 = vpop.f32.mrf.mxu0 }
  0xbf   :  { %v351_v56 = vpop.f32.mrf.mxu1 }
  0xc0   :  { %v352_v57 = vadd.f32 %v351_v56, %v206_v55 }
  0xc2   :  { %v389_v60 = vadd.f32 %v754_v35, %v352_v57 }
  0xc4   :  { %v405_v63 = vmax.f32 %v389_v60, 0.0  ;;  %v231_v32 = vpop.f32.mrf.mxu3  ;;  %v417_v60 = vld [vmem:[%s792_s5] sm:$0xf] }
  0xc6   :  { %v208_v58 = vpop.f32.mrf.mxu0 }
  0xc7   :  { %v353_v59 = vpop.f32.mrf.mxu1 }
  0xc8   :  { %v354_v61 = vadd.f32 %v353_v59, %v208_v58 }
  0xca   :  { %v390_v62 = vadd.f32 %v754_v35, %v354_v61 }
  0xcc   :  { %v406_v0 = vmax.f32 %v390_v62, 0.0  ;;  %v233_v36 = vpop.f32.mrf.mxu3 }
  0xce   :  { %v420_v1 = vpack.c.bf16 %v406_v0, %v405_v63  ;;  %v211_v2 = vpop.f32.mrf.mxu0 }
  0xcf   :  { %v356_v3 = vpop.f32.mrf.mxu1 }
  0xd0   :  { %v357_v4 = vadd.f32 %v356_v3, %v211_v2 }
  0xd2   :  { %v391_v7 = vadd.f32 %v754_v35, %v357_v4 }
  0xd4   :  { %v407_v10 = vmax.f32 %v391_v7, 0.0 }
  0xd6   :  { %v213_v5 = vpop.f32.mrf.mxu0 }
  0xd7   :  { %v358_v6 = vpop.f32.mrf.mxu1 }
  0xd8   :  { %v359_v8 = vadd.f32 %v358_v6, %v213_v5 }
  0xda   :  { %v392_v9 = vadd.f32 %v754_v35, %v359_v8 }
  0xdc   :  { %v408_v11 = vmax.f32 %v392_v9, 0.0 }
  0xde   :  { %v421_v12 = vpack.c.bf16 %v408_v11, %v407_v10  ;;  %v216_v13 = vpop.f32.mrf.mxu0 }
  0xdf   :  { %v361_v14 = vpop.f32.mrf.mxu1 }
  0xe0   :  { %v362_v15 = vadd.f32 %v361_v14, %v216_v13 }
  0xe2   :  { %v393_v19 = vadd.f32 %v754_v35, %v362_v15 }
  0xe4   :  { %v409_v22 = vmax.f32 %v393_v19, 0.0 }
  0xe6   :  { %v218_v17 = vpop.f32.mrf.mxu0 }
  0xe7   :  { %v363_v18 = vpop.f32.mrf.mxu1 }
  0xe8   :  { %v364_v20 = vadd.f32 %v363_v18, %v218_v17 }
  0xea   :  { %v394_v21 = vadd.f32 %v754_v35, %v364_v20 }
  0xec   :  { %v410_v23 = vmax.f32 %v394_v21, 0.0 }
  0xee   :  { %v422_v24 = vpack.c.bf16 %v410_v23, %v409_v22 }
  0xef   :  { %v366_v26 = vpop.f32.mrf.mxu1 }
  0xf0   :  { %v367_v51 = vadd.f32 %v366_v26, %v221_v16 }
  0xf2   :  { %v395_v56 = vadd.f32 %v754_v35, %v367_v51 }
  0xf4   :  { %v411_v58 = vmax.f32 %v395_v56, 0.0 }
  0xf7   :  { %v368_v27 = vpop.f32.mrf.mxu1 }
  0xf8   :  { %v369_v49 = vadd.f32 %v368_v27, %v223_v25 }
  0xfa   :  { %v396_v53 = vadd.f32 %v754_v35, %v369_v49 }
  0xfc   :  { %v412_v57 = vmax.f32 %v396_v53, 0.0 }
  0xfe   :  { %v423_v59 = vpack.c.bf16 %v412_v57, %v411_v58 }
  0xff   :  { %v371_v29 = vpop.f32.mrf.mxu1 }
 0x100   :  { %v372_v42 = vadd.f32 %v371_v29, %v226_v28 }
 0x102   :  { %v397_v48 = vadd.f32 %v754_v35, %v372_v42 }
 0x104   :  { %v413_v52 = vmax.f32 %v397_v48, 0.0 }
 0x107   :  { %v373_v31 = vpop.f32.mrf.mxu1 }
 0x108   :  { %v374_v40 = vadd.f32 %v373_v31, %v228_v30 }
 0x10a   :  { %v398_v46 = vadd.f32 %v754_v35, %v374_v40 }
 0x10c   :  { %v414_v50 = vmax.f32 %v398_v46, 0.0 }
 0x10e   :  { %v424_v55 = vpack.c.bf16 %v414_v50, %v413_v52 }
 0x10f   :  { %v376_v33 = vpop.f32.mrf.mxu1 }
 0x110   :  { %v377_v34 = vadd.f32 %v376_v33, %v231_v32 }
 0x112   :  { %v399_v39 = vadd.f32 %v754_v35, %v377_v34 }
 0x114   :  { %v415_v44 = vmax.f32 %v399_v39, 0.0 }
 0x117   :  { %v378_v37 = vpop.f32.mrf.mxu1 }
 0x118   :  { %v379_v38 = vadd.f32 %v378_v37, %v233_v36 }
 0x11a   :  { %v400_v41 = vadd.f32 %v754_v35, %v379_v38  ;;  %v427_v35 = vstv %s793_s6 }
 0x11c   :  { %v416_v45 = vmax.f32 %v400_v41, 0.0 }
 0x11e   :  { %v425_v47 = vpack.c.bf16 %v416_v45, %v415_v44 }
 0x120   :  { %428 = vmatpush.bf16.xpose.msra.mxu2 %v425_v47 }
 0x128   :  { %429 = vmatpush.bf16.xpose.msra.mxu2 %v424_v55 }
 0x130   :  { %430 = vmatpush.bf16.xpose.msra.mxu2 %v423_v59 }
 0x138   :  { %431 = vmatpush.bf16.xpose.msra.mxu2 %v422_v24 }
 0x140   :  { %432 = vmatpush.bf16.xpose.msra.mxu2 %v421_v12 }
 0x148   :  { %433 = vmatpush.bf16.xpose.msra.mxu2 %v420_v1 }
 0x150   :  { %434 = vmatpush.bf16.xpose.msra.mxu2 %v762_v54 }
 0x158   :  { %435 = vmatpush.bf16.xpose.msra.mxu2 %v758_v43 }
 0x15f   :  { %436 = vmatmul.bf16.vlgmr.msra.gmra.mxu2 %v417_v60 }
 0x1e2   :  { %v437_v61 = vpop.f32.mrf.mxu2 }
 0x1e3   :  { %v438_v62 = vadd.f32 %v437_v61, %v427_v35 }
 0x1e5   :  { %441 = vst [vmem:[%s794_s7] sm:$0xff] %v438_v62 }
 0x1ea   :  { %v439_v63 = vpop.f32.mrf.mxu2 }

</bundles_post_ra>
